<compile_context>
chip_gen: v5e
topology: v5e:2x2
jax: 0.10.0
libtpu: 0.0.40
codegen_flags: <defaults>
</compile_context>

<pallas_src>
import jax
import jax.numpy as jnp
from jax.experimental import pallas as pl
from jax.experimental.pallas import tpu as pltpu

IN_DIM = 512 * 4      # 2048
HID_DIM = 1024
OUT_DIM = 8
BN_EPS = 1e-5
TILE_K = 512          # 2048 / 512 = 4 K-steps; 2 MiB w1 slab per step


def classifier_kernel(x_ref, w1_ref, b1_ref, w2_ref, b2_ref, o_ref, acc_ref):
    """Fused Linear -> (BN folded) -> ReLU -> Linear -> Softmax.

    Grid = (batch_tiles, k_tiles).  K (contraction of the first matmul) is the
    innermost, "arbitrary" axis; acc_ref carries the partial (TILE_B, 1024)
    hidden activations across K steps.
    """
    k = pl.program_id(1)

    @pl.when(k == 0)
    def _():
        acc_ref[...] = jnp.zeros_like(acc_ref)

    # Partial first matmul: (TILE_B, TILE_K) @ (TILE_K, 1024) on the MXU.
    acc_ref[...] += jnp.dot(x_ref[...], w1_ref[...],
                            preferred_element_type=jnp.float32)

    @pl.when(k == pl.num_programs(1) - 1)
    def _():
        # Folded BN bias + ReLU.
        h = jnp.maximum(acc_ref[...] + b1_ref[...], 0.0)
        # Linear 2: (TILE_B, 1024) @ (1024, 8).
        logits = jnp.dot(h, w2_ref[...],
                         preferred_element_type=jnp.float32) + b2_ref[...]
        # Softmax over dim=1 (exact reciprocal keeps 1e-5 parity with f32 ref).
        m = jnp.max(logits, axis=1, keepdims=True)
        e = jnp.exp(logits - m)
        denom = jnp.sum(e, axis=1, keepdims=True)
        o_ref[...] = (e * pl.reciprocal(denom, approx=False)).astype(o_ref.dtype)


def _pick_tile_b(B):
    if B <= 256:
        return B          # single batch tile; block == full dim is legal
    return 256            # multiple of 256 keeps the v6e/v7x 256-wide MXU full


def classifier_forward(x, params):
    """x: (B, 2048) float32 -> (B, 8) float32 softmax probabilities."""
    B = x.shape[0]
    w1, b1, gamma, beta, run_mean, run_var, w2, b2 = params

    # Fold BatchNorm (eval mode, running stats) into the first Linear:
    #   y = (x@w1 + b1 - mean) * gamma/sqrt(var+eps) + beta
    #     = x @ (w1 * s) + ((b1 - mean) * s + beta),   s = gamma/sqrt(var+eps)
    s = gamma / jnp.sqrt(run_var + BN_EPS)
    w1f = (w1 * s[None, :]).astype(jnp.float32)
    b1f = ((b1 - run_mean) * s + beta).reshape(1, HID_DIM).astype(jnp.float32)
    b2_2d = b2.reshape(1, OUT_DIM).astype(jnp.float32)

    tile_b = _pick_tile_b(B)
    grid_b = pl.cdiv(B, tile_b)
    grid_k = IN_DIM // TILE_K

    flops = 2 * B * IN_DIM * HID_DIM + 2 * B * HID_DIM * OUT_DIM
    bytes_accessed = 4 * (x.size + w1f.size + w2.size + b1f.size
                          + b2_2d.size + B * OUT_DIM)

    return pl.pallas_call(
        classifier_kernel,
        out_shape=jax.ShapeDtypeStruct((B, OUT_DIM), jnp.float32),
        grid_spec=pltpu.PrefetchScalarGridSpec(
            num_scalar_prefetch=0,
            grid=(grid_b, grid_k),
            in_specs=[
                pl.BlockSpec((tile_b, TILE_K), lambda i, k: (i, k)),    # x tile
                pl.BlockSpec((TILE_K, HID_DIM), lambda i, k: (k, 0)),   # w1 (BN-folded)
                pl.BlockSpec((1, HID_DIM), lambda i, k: (0, 0)),        # b1 (BN-folded)
                pl.BlockSpec((HID_DIM, OUT_DIM), lambda i, k: (0, 0)),  # w2
                pl.BlockSpec((1, OUT_DIM), lambda i, k: (0, 0)),        # b2
            ],
            out_specs=pl.BlockSpec((tile_b, OUT_DIM), lambda i, k: (i, 0)),
            scratch_shapes=[pltpu.VMEM((tile_b, HID_DIM), jnp.float32)],
        ),
        compiler_params=pltpu.CompilerParams(
            dimension_semantics=("parallel", "arbitrary"),
            vmem_limit_bytes=32 << 20,
        ),
        cost_estimate=pl.CostEstimate(
            flops=flops,
            transcendentals=B * OUT_DIM,
            bytes_accessed=bytes_accessed,
        ),
    )(x, w1f, b1f, w2, b2_2d)


def init_params(key):
    """Deterministic synthetic parameters with PyTorch-init-like scales."""
    k1, k2, k3, k4 = jax.random.split(key, 4)
    bound1 = 1.0 / jnp.sqrt(IN_DIM)
    bound2 = 1.0 / jnp.sqrt(HID_DIM)
    w1 = jax.random.uniform(k1, (IN_DIM, HID_DIM), jnp.float32, -bound1, bound1)
    b1 = jax.random.uniform(k2, (HID_DIM,), jnp.float32, -bound1, bound1)
    gamma = jnp.ones((HID_DIM,), jnp.float32)
    beta = jnp.zeros((HID_DIM,), jnp.float32)
    run_mean = jnp.zeros((HID_DIM,), jnp.float32)
    run_var = jnp.ones((HID_DIM,), jnp.float32)
    w2 = jax.random.uniform(k3, (HID_DIM, OUT_DIM), jnp.float32, -bound2, bound2)
    b2 = jax.random.uniform(k4, (OUT_DIM,), jnp.float32, -bound2, bound2)
    return (w1, b1, gamma, beta, run_mean, run_var, w2, b2)


def reference_forward(x, params):
    """Pure-JAX reference (unfolded BN) for correctness check."""
    w1, b1, gamma, beta, run_mean, run_var, w2, b2 = params
    h = x @ w1 + b1
    h = (h - run_mean) / jnp.sqrt(run_var + BN_EPS) * gamma + beta
    h = jnp.maximum(h, 0.0)
    logits = h @ w2 + b2
    return jax.nn.softmax(logits, axis=1)


if __name__ == "__main__":
    key = jax.random.PRNGKey(0)
    kp, kx1, kx2 = jax.random.split(key, 3)
    params = init_params(kp)

    # Primary small case (B=2), plus a multi-batch-tile case (B=512) that
    # exercises the parallel batch grid axis and accumulator reuse.
    for B, kx in ((2, kx1), (512, kx2)):
        x = jax.random.normal(kx, (B, IN_DIM), dtype=jnp.float32)
        out = jax.block_until_ready(classifier_forward(x, params))
        ref = reference_forward(x, params)
        assert out.shape == (B, OUT_DIM)
        assert jnp.allclose(out, ref, atol=1e-5, rtol=1e-5), f"mismatch vs reference (B={B})"
        assert jnp.allclose(jnp.sum(out, axis=1), 1.0, atol=1e-5), "softmax rows must sum to 1"

    print("KERNEL_OK")
</pallas_src>

<mosaic_0001>
module attributes {stable_mosaic.version = 11 : i64} {
  func.func @classifier_kernel(%arg0: i32, %arg1: i32, %arg2: memref<2x512xf32, #tpu.memory_space<vmem>>, %arg3: memref<512x1024xf32, #tpu.memory_space<vmem>>, %arg4: memref<1x1024xf32, #tpu.memory_space<vmem>>, %arg5: memref<1024x8xf32, #tpu.memory_space<vmem>>, %arg6: memref<1x8xf32, #tpu.memory_space<vmem>>, %arg7: memref<2x8xf32, #tpu.memory_space<vmem>>, %arg8: memref<2x1024xf32, #tpu.memory_space<vmem>>) attributes {dimension_semantics = [#tpu.dimension_semantics<parallel>, #tpu.dimension_semantics<arbitrary>], iteration_bounds = array<i64: 1, 4>, scalar_prefetch = 0 : i64, scratch_operands = 1 : i64, tpu.core_type = #tpu.core_type<tc>, window_params = [{transform_indices = @transform_0, window_bounds = array<i64: 2, 512>}, {transform_indices = @transform_1, window_bounds = array<i64: 512, 1024>}, {pipeline_mode = #tpu.pipeline_mode<synchronous>, transform_indices = @transform_2, window_bounds = array<i64: 1, 1024>}, {pipeline_mode = #tpu.pipeline_mode<synchronous>, transform_indices = @transform_3, window_bounds = array<i64: 1024, 8>}, {pipeline_mode = #tpu.pipeline_mode<synchronous>, transform_indices = @transform_4, window_bounds = array<i64: 1, 8>}, {transform_indices = @transform_5, window_bounds = array<i64: 2, 8>}]} {
    %c0_i32 = arith.constant 0 : i32
    %0 = arith.cmpi eq, %arg1, %c0_i32 : i32
    %1 = arith.extui %0 : i1 to i32
    %c0_i32_0 = arith.constant 0 : i32
    %2 = arith.cmpi ne, %1, %c0_i32_0 : i32
    scf.if %2 {
      %cst_9 = arith.constant 0.000000e+00 : f32
      %12 = vector.broadcast %cst_9 : f32 to vector<2x1024xf32>
      %c0_10 = arith.constant 0 : index
      %c0_11 = arith.constant 0 : index
      %13 = vector.load %arg8[%c0_10, %c0_11] : memref<2x1024xf32, #tpu.memory_space<vmem>>, vector<2x1024xf32>
      tpu.vector_store %arg8[%c0_10, %c0_11], %12 {strides = array<i32>} : memref<2x1024xf32, #tpu.memory_space<vmem>>, vector<2x1024xf32>,
    } else {
    }
    %c0 = arith.constant 0 : index
    %c0_1 = arith.constant 0 : index
    %3 = vector.load %arg8[%c0, %c0_1] : memref<2x1024xf32, #tpu.memory_space<vmem>>, vector<2x1024xf32>
    %c0_2 = arith.constant 0 : index
    %c0_3 = arith.constant 0 : index
    %4 = vector.load %arg2[%c0_2, %c0_3] : memref<2x512xf32, #tpu.memory_space<vmem>>, vector<2x512xf32>
    %c0_4 = arith.constant 0 : index
    %c0_5 = arith.constant 0 : index
    %5 = vector.load %arg3[%c0_4, %c0_5] : memref<512x1024xf32, #tpu.memory_space<vmem>>, vector<512x1024xf32>
    %cst = arith.constant dense<0.000000e+00> : vector<2x1024xf32>
    %6 = tpu.matmul %4, %5, %cst {dimension_numbers = #tpu.dot_dimension_numbers<[1], [0], [0], [1], [0, 0, 1, 1], [], []>} : vector<2x512xf32>, vector<512x1024xf32>, vector<2x1024xf32> -> vector<2x1024xf32>
    %7 = arith.addf %3, %6 : vector<2x1024xf32>
    %c0_6 = arith.constant 0 : index
    %c0_7 = arith.constant 0 : index
    %8 = vector.load %arg8[%c0_6, %c0_7] : memref<2x1024xf32, #tpu.memory_space<vmem>>, vector<2x1024xf32>
    tpu.vector_store %arg8[%c0_6, %c0_7], %7 {strides = array<i32>} : memref<2x1024xf32, #tpu.memory_space<vmem>>, vector<2x1024xf32>,
    %c3_i32 = arith.constant 3 : i32
    %9 = arith.cmpi eq, %arg1, %c3_i32 : i32
    %10 = arith.extui %9 : i1 to i32
    %c0_i32_8 = arith.constant 0 : i32
    %11 = arith.cmpi ne, %10, %c0_i32_8 : i32
    scf.if %11 {
      %c0_9 = arith.constant 0 : index
      %c0_10 = arith.constant 0 : index
      %12 = vector.load %arg8[%c0_9, %c0_10] : memref<2x1024xf32, #tpu.memory_space<vmem>>, vector<2x1024xf32>
      %c0_11 = arith.constant 0 : index
      %c0_12 = arith.constant 0 : index
      %13 = vector.load %arg4[%c0_11, %c0_12] : memref<1x1024xf32, #tpu.memory_space<vmem>>, vector<1x1024xf32>
      %14 = vector.broadcast %13 : vector<1x1024xf32> to vector<2x1024xf32>
      %15 = arith.addf %12, %14 : vector<2x1024xf32>
      %cst_13 = arith.constant 0.000000e+00 : f32
      %16 = vector.broadcast %cst_13 : f32 to vector<2x1024xf32>
      %17 = arith.maximumf %15, %16 : vector<2x1024xf32>
      %c0_14 = arith.constant 0 : index
      %c0_15 = arith.constant 0 : index
      %18 = vector.load %arg5[%c0_14, %c0_15] : memref<1024x8xf32, #tpu.memory_space<vmem>>, vector<1024x8xf32>
      %cst_16 = arith.constant dense<0.000000e+00> : vector<2x8xf32>
      %19 = tpu.matmul %17, %18, %cst_16 {dimension_numbers = #tpu.dot_dimension_numbers<[1], [0], [0], [1], [0, 0, 1, 1], [], []>} : vector<2x1024xf32>, vector<1024x8xf32>, vector<2x8xf32> -> vector<2x8xf32>
      %c0_17 = arith.constant 0 : index
      %c0_18 = arith.constant 0 : index
      %20 = vector.load %arg6[%c0_17, %c0_18] : memref<1x8xf32, #tpu.memory_space<vmem>>, vector<1x8xf32>
      %21 = vector.broadcast %20 : vector<1x8xf32> to vector<2x8xf32>
      %22 = arith.addf %19, %21 : vector<2x8xf32>
      %cst_19 = arith.constant dense<0xFF800000> : vector<2xf32>
      %23 = vector.multi_reduction <maximumf>, %22, %cst_19 [1] : vector<2x8xf32> to vector<2xf32>
      %24 = vector.shape_cast %23 : vector<2xf32> to vector<2x1xf32>
      %25 = vector.broadcast %24 : vector<2x1xf32> to vector<2x8xf32>
      %26 = arith.subf %22, %25 : vector<2x8xf32>
      %27 = math.exp %26 : vector<2x8xf32>
      %cst_20 = arith.constant dense<0.000000e+00> : vector<2xf32>
      %28 = vector.multi_reduction <add>, %27, %cst_20 [1] : vector<2x8xf32> to vector<2xf32>
      %29 = vector.shape_cast %28 : vector<2xf32> to vector<2x1xf32>
      %30 = tpu.reciprocal %29 : vector<2x1xf32> -> vector<2x1xf32>
      %31 = vector.broadcast %30 : vector<2x1xf32> to vector<2x8xf32>
      %32 = arith.mulf %27, %31 : vector<2x8xf32>
      %c0_21 = arith.constant 0 : index
      %c0_22 = arith.constant 0 : index
      %33 = vector.load %arg7[%c0_21, %c0_22] : memref<2x8xf32, #tpu.memory_space<vmem>>, vector<2x8xf32>
      tpu.vector_store %arg7[%c0_21, %c0_22], %32 {strides = array<i32>} : memref<2x8xf32, #tpu.memory_space<vmem>>, vector<2x8xf32>,
    } else {
    }
    return
  }
  func.func @transform_0(%arg0: i32, %arg1: i32) -> (i32, i32) {
    %c0_i32 = arith.constant 0 : i32
    return %arg0, %arg1 : i32, i32
  }
  func.func @transform_1(%arg0: i32, %arg1: i32) -> (i32, i32) {
    %c0_i32 = arith.constant 0 : i32
    %c0_i32_0 = arith.constant 0 : i32
    return %arg1, %c0_i32 : i32, i32
  }
  func.func @transform_2(%arg0: i32, %arg1: i32) -> (i32, i32) {
    %c0_i32 = arith.constant 0 : i32
    %c0_i32_0 = arith.constant 0 : i32
    %c0_i32_1 = arith.constant 0 : i32
    return %c0_i32, %c0_i32_0 : i32, i32
  }
  func.func @transform_3(%arg0: i32, %arg1: i32) -> (i32, i32) {
    %c0_i32 = arith.constant 0 : i32
    %c0_i32_0 = arith.constant 0 : i32
    %c0_i32_1 = arith.constant 0 : i32
    return %c0_i32, %c0_i32_0 : i32, i32
  }
  func.func @transform_4(%arg0: i32, %arg1: i32) -> (i32, i32) {
    %c0_i32 = arith.constant 0 : i32
    %c0_i32_0 = arith.constant 0 : i32
    %c0_i32_1 = arith.constant 0 : i32
    return %c0_i32, %c0_i32_0 : i32, i32
  }
  func.func @transform_5(%arg0: i32, %arg1: i32) -> (i32, i32) {
    %c0_i32 = arith.constant 0 : i32
    %c0_i32_0 = arith.constant 0 : i32
    return %arg0, %c0_i32 : i32, i32
  }
}

</mosaic_0001>

<bundles_post_ra>
// kernel: tpu_custom_call.1
= control target key start
LH: loop header
LB: loop body
LE: loop exit
PB: predicated region body
PF: predicated region fallthrough
CT: control target
= control target key end

     0   :  { %s3514_s0 = inlined_call_operand.hbm [shape: f32[2,2048], index: 0, kind: input, shape index: {}]   ;;  %s3515_s1 = inlined_call_operand.hbm [shape: f32[2048,1024], index: 1, kind: input, shape index: {}]   ;;  %s3516_s2 = inlined_call_operand.hbm [shape: f32[1,1024], index: 2, kind: input, shape index: {}]   ;;  %s3517_s3 = inlined_call_operand.vmem [shape: f32[1024,8], index: 3, kind: input, shape index: {}]   ;;  %s3518_s4 = inlined_call_operand.hbm [shape: f32[1,8], index: 4, kind: input, shape index: {}]   ;;  %s3519_s5 = inlined_call_operand.hbm [shape: f32[2,8], index: 5, kind: output, shape index: {}]  }
   0x1   :  { %3520 = sst [smem:[#allocation17_spill]] %s3514_s0 }
   0x2   :  { %3521 = sst [smem:[#allocation18_spill]] %s3516_s2 }
   0x3   :  { %10 = vsyncpa [#allocation4], 0 }
   0x4   :  { %12 = vsyncpa [#allocation4 + $0x1], 0 }
   0x5   :  { %13 = vsyncpa [#allocation7], 0 }
   0x6   :  { %15 = vsyncpa [#allocation7 + $0x1], 0 }
   0x7   :  { %16 = vsyncpa [#allocation10], 0 }
   0x8   :  { %17 = vsyncpa [#allocation5], 0  ;;  %s2394_s18 = smov 0   ;;  %s2396_s19 = smov 0  }
   0x9   :  { %s2398_s20 = smov 0   ;;  %s2400_s21 = smov 0  }
   0xa   :  { %s2402_s22 = smov 0   ;;  %s2404_s23 = smov 0  }
   0xb LB: > { %s2423_s24 = sadd.s32 4294967295, %s2356_s23   ;;  %p57_p0 = scmp.ne.s32.totalorder %s2340_s19, %s2336_s18  ;;  %s2356_s23 = sphi %s2404_s23, %s23_s23   ;;  %s2352_s22 = sphi %s2402_s22, %s3532_s22   ;;  %s2348_s21 = sphi %s2400_s21, %s3531_s21   ;;  %s2344_s20 = sphi %s2398_s20, %s3530_s20   ;;  %s2340_s19 = sphi %s2396_s19, %s3529_s19   ;;  %s2336_s18 = sphi %s2394_s18, %s3528_s18  }
   0xc   : > { %p58_p1 = scmp.eq.s32.totalorder %s2423_s24, 0  ;;  %p2017_p2 = scmp.ge.s32.totalorder %s2356_s23, 1 }
   0xd   : > { %p183_p3 = scmp.lt.s32.totalorder %s2356_s23, 5  ;;  %s3523_s2 = sld [smem:[#allocation18_spill]] }
   0xe   : > { %p2431_p4 = por %p58_p1, %p57_p0  ;;  %s2358_s30 = smov [#allocation8]  }
   0xf   : > { %p2438_p5 = pnand %p2017_p2, %p183_p3  ;;  %s197_s6 = sshll.u32 %s2358_s30, 4  ;;  %s198_s6 = int_to_ptr.vmem [resolvable:$true] %s197_s6 }
  0x10   : > { %s210_s9 = sshll.u32 %s3518_s4, 4  ;;  %s2359_s10 = smov [#allocation9]   ;;  %s211_s9 = int_to_ptr.hbm [resolvable:$true] %s210_s9 }
  0x11   : > { %p2058_p6 = pneg %p2438_p5  ;;  %s212_s11 = sshll.u32 %s2359_s10, 4  ;;  %s213_s11 = int_to_ptr.vmem [resolvable:$true] %s212_s11 }
  0x12   : > { %s32_s12 = sadd.s32 1, %s2352_s22  ;;  %s44_s13 = sadd.s32 1, %s2344_s20 }
  0x13   : > { %s195_s28 = sshll.u32 %s3523_s2, 4  ;;  %p2059_p7 = pnand %p2058_p6, %p58_p1  ;;  %s196_s28 = int_to_ptr.hbm [resolvable:$true] %s195_s28 }
  0x14   : > { %p33_p8 = scmp.ge.s32.totalorder %s32_s12, 4  ;;  %p51_p9 = scmp.ne.s32.totalorder %s2344_s20, %s2340_s19 }
  0x15   : > { %2061 = dma.hbm_to_vmem [thread:$0]  (!%p2059_p7), %s196_s28, 128, %s198_s6, [#allocation7]  }
  0x16   : > { %2064 = dma.hbm_to_vmem [thread:$0]  (!%p2059_p7), %s211_s9, 16, %s213_s11, [#allocation10]  }
  0x17   : > { %p52_p10 = scmp.eq.s32.totalorder %s2356_s23, 0  ;;  %p2074_p11 = scmp.lt.s32.totalorder %s2356_s23, 4 }
  0x18   : > { %s3534_s12 = smov (%p33_p8, %s32_s12), 0  ;;  %s223_s15 = sand.u32 1, %s2344_s20  }
  0x19   : > { %p2457_p12 = por %p52_p10, %p51_p9  ;;  %s40_s16 = ssub.s32 %s2352_s22, %s3534_s12 }
  0x1a   : > { %p42_p13 = scmp.eq.s32.totalorder %s40_s16, 0  ;;  %s2021_s17 = sshll.u32 %s223_s15, 3 }
  0x1b   : > { %s2039_s18 = sshll.u32 %s2352_s22, 3  ;;  %s3526_s0 = sld [smem:[#allocation17_spill]] }
  0x1c   : > { %s2466_s26 = scalar_select %p42_p13, %s2344_s20, %s44_s13  }
  0x1d   : > { %s227_s6 = scalar_lea.vmem [#allocation3], %s2021_s17  ;;  %p2475_p0 = pnand %p2074_p11, %p2457_p12 }
  0x1e   : > { %s238_s7 = sshll.u32 %s227_s6, 4  ;;  %s2024_s10 = sshll.u32 %s223_s15, 12  ;;  %s239_s7 = int_to_ptr.vmem [resolvable:$true] %s238_s7 }
  0x1f   : > { %s2041_s11 = sshll.u32 %s2352_s22, 12  ;;  %s224_s13 = scalar_lea.sflag [#allocation4], %s223_s15 }
  0x20   : > { %s249_s16 = scalar_lea.vmem [#allocation6], %s2024_s10  ;;  %s245_s17 = sand.u32 1, %s2356_s23  }
  0x21   : > { %s234_s30 = scalar_lea.hbm %s3526_s0, %s2039_s18  ;;  %s258_s18 = sshll.u32 %s249_s16, 4  ;;  %s259_s18 = int_to_ptr.vmem [resolvable:$true] %s258_s18 }
  0x22   : > { %s236_s8 = sshll.u32 %s234_s30, 4  ;;  %s255_s14 = scalar_lea.hbm %s3515_s1, %s2041_s11  ;;  %s237_s8 = int_to_ptr.hbm [resolvable:$true] %s236_s8 }
  0x23   : > { %2068 = dma.hbm_to_vmem [thread:$0]  (!%p2475_p0), %s237_s8, 128, %s239_s7, %s224_s13  }
  0x24   : > { %s256_s30 = sshll.u32 %s255_s14, 4  ;;  %s246_s6 = scalar_lea.sflag [#allocation7], %s245_s17  ;;  %s257_s30 = int_to_ptr.hbm [resolvable:$true] %s256_s30 }
  0x25   : > { %s2360_s0 = smov 1024   ;;  %s2361_s2 = smov 64  }
  0x26   : > { %2071 = dma.hbm_to_vmem [thread:$0]  (!%p2475_p0), %s257_s30, 65536, %s259_s18, %s246_s6, %s2360_s0, %s2360_s0, %s2361_s2  }
  0x27   : > { %270 = sbr.rel (%p2438_p5) target bundleno = 977 (0x3d1), region = 40  ;;  %s272_s15 = sand.u32 (!%p2438_p5), 1, %s2340_s19  }
  0x28   : > { %s2029_s7 = sshll.u32 (!%p2438_p5), %s272_s15, 3  ;;  %s273_s8 = scalar_lea.sflag (!%p2438_p5), [#allocation4], %s272_s15 }
  0x29   : > { %s2491_s10 = scalar_lea.vmem (!%p2438_p5), [#allocation3], %s2029_s7 }
  0x2c   : > { %2315 = dma.done.wait (%p2431_p4), %s273_s8, 128  }
  0x2d   : > { %2317 = vsyncadd (%p2431_p4), %s273_s8, 4294967168  ;;  %s282_s11 = sand.u32 1, %s2423_s24   ;;  %s2030_s9 = sshll.u32 %s272_s15, 12 }
  0x2e   : > { %s283_s0 = scalar_lea.sflag [#allocation7], %s282_s11  ;;  %s2498_s2 = scalar_lea.vmem [#allocation6], %s2030_s9 }
  0x2f   : > { %2319 = dma.done.wait (%p2431_p4), %s283_s0, 65536  }
  0x30   : > { %2321 = vsyncadd (%p2431_p4), %s283_s0, 4294901760 }
  0x31   : > { %2323 = dma.done.wait (%p58_p1), [#allocation7], 128  }
  0x32   : > { %2325 = vsyncadd (%p58_p1), [#allocation7], 4294967168 }
  0x33   : > { %2327 = dma.done.wait (%p58_p1), [#allocation10], 16  }
  0x34   : > { %2329 = vsyncadd (%p58_p1), [#allocation10], 4294967280  ;;  %p2033_p2 = scmp.ne.s32.totalorder %s2348_s21, 0 }
  0x36   : > { %329 = sbr.rel (%p2033_p2) target bundleno = 62 (0x3e), region = 60 }
  0x3b   : > { %v2362_v0 = vmov 0.0  }
  0x3c   : > { %330 = vst [vmem:[#allocation2] sm:$0xff] %v2362_v0 }
  0x3d   : > { %331 = vst [vmem:[#allocation2 + $0x8] sm:$0xff] %v2362_v0 }
  0x3e PF: > { %v711_v1 = vld [vmem:[%s2498_s2 + $0xbc0] sm:$0xff]  ;;  %v712_v63 = vld [vmem:[%s2498_s2 + $0xbc8] sm:$0xff]  ;;  %vm1511_vm0 = vcmask 1041408   ;;  %vm1513_vm1 = vcmask 1045508   ;;  %vm1515_vm2 = vcmask 1043456   ;;  %p2034_p1 = scmp.ne.s32.totalorder %s2348_s21, 3 }
  0x3f   : > { %v703_v2 = vld [vmem:[%s2498_s2 + $0xb80] sm:$0xff]  ;;  %897 = vmatpush.msra.mxu2 %v711_v1  ;;  %v840_v0 = vld [vmem:[%s2498_s2 + $0xfc8] sm:$0xff] }
  0x40   : > { %v839_v3 = vld [vmem:[%s2498_s2 + $0xfc0] sm:$0xff] }
  0x41   : > { %917 = vmatpush.msra.mxu3 %v839_v3  ;;  %v455_v4 = vld [vmem:[%s2498_s2 + $0x3c0] sm:$0xff]  ;;  %898 = vmatpush.msra.mxu2 %v703_v2  ;;  %v704_v3 = vld [vmem:[%s2498_s2 + $0xb88] sm:$0xff] }
  0x42   : > { %v583_v5 = vld [vmem:[%s2498_s2 + $0x7c0] sm:$0xff]  ;;  %857 = vmatpush.msra.mxu0 %v455_v4  ;;  %v456_v4 = vld [vmem:[%s2498_s2 + $0x3c8] sm:$0xff] }
  0x43   : > { %v695_v6 = vld [vmem:[%s2498_s2 + $0xb40] sm:$0xff]  ;;  %877 = vmatpush.msra.mxu1 %v583_v5  ;;  %v584_v5 = vld [vmem:[%s2498_s2 + $0x7c8] sm:$0xff] }
  0x44   : > { %v831_v7 = vld [vmem:[%s2498_s2 + $0xf80] sm:$0xff]  ;;  %899 = vmatpush.msra.mxu2 %v695_v6  ;;  %v832_v6 = vld [vmem:[%s2498_s2 + $0xf88] sm:$0xff] }
  0x45   : > { %v447_v8 = vld [vmem:[%s2498_s2 + $0x380] sm:$0xff]  ;;  %918 = vmatpush.msra.mxu3 %v831_v7  ;;  %v696_v7 = vld [vmem:[%s2498_s2 + $0xb48] sm:$0xff] }
  0x46   : > { %v575_v9 = vld [vmem:[%s2498_s2 + $0x780] sm:$0xff]  ;;  %858 = vmatpush.msra.mxu0 %v447_v8  ;;  %v448_v8 = vld [vmem:[%s2498_s2 + $0x388] sm:$0xff] }
  0x47   : > { %v823_v10 = vld [vmem:[%s2498_s2 + $0xf40] sm:$0xff]  ;;  %878 = vmatpush.msra.mxu1 %v575_v9  ;;  %v576_v9 = vld [vmem:[%s2498_s2 + $0x788] sm:$0xff] }
  0x48   : > { %v439_v11 = vld [vmem:[%s2498_s2 + $0x340] sm:$0xff]  ;;  %919 = vmatpush.msra.mxu3 %v823_v10  ;;  %v824_v10 = vld [vmem:[%s2498_s2 + $0xf48] sm:$0xff] }
  0x49   : > { %v687_v12 = vld [vmem:[%s2498_s2 + $0xb00] sm:$0xff]  ;;  %859 = vmatpush.msra.mxu0 %v439_v11  ;;  %v688_v11 = vld [vmem:[%s2498_s2 + $0xb08] sm:$0xff] }
  0x4a   : > { %v567_v13 = vld [vmem:[%s2498_s2 + $0x740] sm:$0xff]  ;;  %900 = vmatpush.msra.mxu2 %v687_v12  ;;  %v440_v12 = vld [vmem:[%s2498_s2 + $0x348] sm:$0xff] }
  0x4b   : > { %v815_v14 = vld [vmem:[%s2498_s2 + $0xf00] sm:$0xff]  ;;  %879 = vmatpush.msra.mxu1 %v567_v13  ;;  %v334_v13 = vld [vmem:[%s2491_s10] sm:$0xff] }
  0x4c   : > { %v431_v15 = vld [vmem:[%s2498_s2 + $0x300] sm:$0xff]  ;;  %920 = vmatpush.msra.mxu3 %v815_v14  ;;  %v568_v14 = vld [vmem:[%s2498_s2 + $0x748] sm:$0xff]  ;;  %848 = vst [vmem:[#allocation1] ss:$4 sm:$0xff] %v334_v13  ;;  %v449_v13 = vld [vmem:[%s2498_s2 + $0x390] sm:$0xff] }
  0x4d   : > { %v559_v16 = vld [vmem:[%s2498_s2 + $0x700] sm:$0xff]  ;;  %860 = vmatpush.msra.mxu0 %v431_v15  ;;  %v816_v15 = vld [vmem:[%s2498_s2 + $0xf08] sm:$0xff] }
  0x4e   : > { %v679_v17 = vld [vmem:[%s2498_s2 + $0xac0] sm:$0xff]  ;;  %880 = vmatpush.msra.mxu1 %v559_v16  ;;  %v680_v16 = vld [vmem:[%s2498_s2 + $0xac8] sm:$0xff] }
  0x4f   : > { %v807_v18 = vld [vmem:[%s2498_s2 + $0xec0] sm:$0xff]  ;;  %901 = vmatpush.msra.mxu2 %v679_v17  ;;  %v432_v17 = vld [vmem:[%s2498_s2 + $0x308] sm:$0xff] }
  0x50   : > { %v423_v19 = vld [vmem:[%s2498_s2 + $0x2c0] sm:$0xff]  ;;  %921 = vmatpush.msra.mxu3 %v807_v18  ;;  %v560_v18 = vld [vmem:[%s2498_s2 + $0x708] sm:$0xff] }
  0x51   : > { %v551_v20 = vld [vmem:[%s2498_s2 + $0x6c0] sm:$0xff]  ;;  %861 = vmatpush.msra.mxu0 %v423_v19  ;;  %v808_v19 = vld [vmem:[%s2498_s2 + $0xec8] sm:$0xff] }
  0x52   : > { %v671_v21 = vld [vmem:[%s2498_s2 + $0xa80] sm:$0xff]  ;;  %881 = vmatpush.msra.mxu1 %v551_v20  ;;  %v672_v20 = vld [vmem:[%s2498_s2 + $0xa88] sm:$0xff] }
  0x53   : > { %v799_v22 = vld [vmem:[%s2498_s2 + $0xe80] sm:$0xff]  ;;  %902 = vmatpush.msra.mxu2 %v671_v21  ;;  %v424_v21 = vld [vmem:[%s2498_s2 + $0x2c8] sm:$0xff] }
  0x54   : > { %v415_v23 = vld [vmem:[%s2498_s2 + $0x280] sm:$0xff]  ;;  %922 = vmatpush.msra.mxu3 %v799_v22  ;;  %v552_v22 = vld [vmem:[%s2498_s2 + $0x6c8] sm:$0xff] }
  0x55   : > { %v543_v24 = vld [vmem:[%s2498_s2 + $0x680] sm:$0xff]  ;;  %862 = vmatpush.msra.mxu0 %v415_v23  ;;  %v800_v23 = vld [vmem:[%s2498_s2 + $0xe88] sm:$0xff] }
  0x56   : > { %v663_v25 = vld [vmem:[%s2498_s2 + $0xa40] sm:$0xff]  ;;  %882 = vmatpush.msra.mxu1 %v543_v24  ;;  %v664_v24 = vld [vmem:[%s2498_s2 + $0xa48] sm:$0xff] }
  0x57   : > { %v791_v26 = vld [vmem:[%s2498_s2 + $0xe40] sm:$0xff]  ;;  %903 = vmatpush.msra.mxu2 %v663_v25  ;;  %v416_v25 = vld [vmem:[%s2498_s2 + $0x288] sm:$0xff] }
  0x58   : > { %v407_v27 = vld [vmem:[%s2498_s2 + $0x240] sm:$0xff]  ;;  %923 = vmatpush.msra.mxu3 %v791_v26  ;;  %v544_v26 = vld [vmem:[%s2498_s2 + $0x688] sm:$0xff] }
  0x59   : > { %v535_v28 = vld [vmem:[%s2498_s2 + $0x640] sm:$0xff]  ;;  %863 = vmatpush.msra.mxu0 %v407_v27  ;;  %v792_v27 = vld [vmem:[%s2498_s2 + $0xe48] sm:$0xff] }
  0x5a   : > { %v655_v29 = vld [vmem:[%s2498_s2 + $0xa00] sm:$0xff]  ;;  %883 = vmatpush.msra.mxu1 %v535_v28  ;;  %v656_v28 = vld [vmem:[%s2498_s2 + $0xa08] sm:$0xff] }
  0x5b   : > { %v783_v30 = vld [vmem:[%s2498_s2 + $0xe00] sm:$0xff]  ;;  %904 = vmatpush.msra.mxu2 %v655_v29  ;;  %v408_v29 = vld [vmem:[%s2498_s2 + $0x248] sm:$0xff] }
  0x5c   : > { %v399_v31 = vld [vmem:[%s2498_s2 + $0x200] sm:$0xff]  ;;  %924 = vmatpush.msra.mxu3 %v783_v30  ;;  %v536_v30 = vld [vmem:[%s2498_s2 + $0x648] sm:$0xff] }
  0x5d   : > { %v527_v32 = vld [vmem:[%s2498_s2 + $0x600] sm:$0xff]  ;;  %864 = vmatpush.msra.mxu0 %v399_v31  ;;  %v784_v31 = vld [vmem:[%s2498_s2 + $0xe08] sm:$0xff] }
  0x5e   : > { %v647_v33 = vld [vmem:[%s2498_s2 + $0x9c0] sm:$0xff]  ;;  %884 = vmatpush.msra.mxu1 %v527_v32  ;;  %v648_v32 = vld [vmem:[%s2498_s2 + $0x9c8] sm:$0xff] }
  0x5f   : > { %v775_v34 = vld [vmem:[%s2498_s2 + $0xdc0] sm:$0xff]  ;;  %905 = vmatpush.msra.mxu2 %v647_v33  ;;  %v400_v33 = vld [vmem:[%s2498_s2 + $0x208] sm:$0xff] }
  0x60   : > { %v391_v35 = vld [vmem:[%s2498_s2 + $0x1c0] sm:$0xff]  ;;  %925 = vmatpush.msra.mxu3 %v775_v34  ;;  %v528_v34 = vld [vmem:[%s2498_s2 + $0x608] sm:$0xff] }
  0x61   : > { %v519_v36 = vld [vmem:[%s2498_s2 + $0x5c0] sm:$0xff]  ;;  %865 = vmatpush.msra.mxu0 %v391_v35  ;;  %v776_v35 = vld [vmem:[%s2498_s2 + $0xdc8] sm:$0xff] }
  0x62   : > { %v639_v37 = vld [vmem:[%s2498_s2 + $0x980] sm:$0xff]  ;;  %885 = vmatpush.msra.mxu1 %v519_v36  ;;  %v640_v36 = vld [vmem:[%s2498_s2 + $0x988] sm:$0xff] }
  0x63   : > { %v767_v38 = vld [vmem:[%s2498_s2 + $0xd80] sm:$0xff]  ;;  %906 = vmatpush.msra.mxu2 %v639_v37  ;;  %v392_v37 = vld [vmem:[%s2498_s2 + $0x1c8] sm:$0xff] }
  0x64   : > { %v383_v39 = vld [vmem:[%s2498_s2 + $0x180] sm:$0xff]  ;;  %926 = vmatpush.msra.mxu3 %v767_v38  ;;  %v520_v38 = vld [vmem:[%s2498_s2 + $0x5c8] sm:$0xff] }
  0x65   : > { %v511_v40 = vld [vmem:[%s2498_s2 + $0x580] sm:$0xff]  ;;  %866 = vmatpush.msra.mxu0 %v383_v39  ;;  %v768_v39 = vld [vmem:[%s2498_s2 + $0xd88] sm:$0xff] }
  0x66   : > { %v631_v41 = vld [vmem:[%s2498_s2 + $0x940] sm:$0xff]  ;;  %886 = vmatpush.msra.mxu1 %v511_v40  ;;  %v632_v40 = vld [vmem:[%s2498_s2 + $0x948] sm:$0xff] }
  0x67   : > { %v759_v42 = vld [vmem:[%s2498_s2 + $0xd40] sm:$0xff]  ;;  %907 = vmatpush.msra.mxu2 %v631_v41  ;;  %v384_v41 = vld [vmem:[%s2498_s2 + $0x188] sm:$0xff] }
  0x68   : > { %v375_v43 = vld [vmem:[%s2498_s2 + $0x140] sm:$0xff]  ;;  %927 = vmatpush.msra.mxu3 %v759_v42  ;;  %v512_v42 = vld [vmem:[%s2498_s2 + $0x588] sm:$0xff] }
  0x69   : > { %v503_v44 = vld [vmem:[%s2498_s2 + $0x540] sm:$0xff]  ;;  %867 = vmatpush.msra.mxu0 %v375_v43  ;;  %v760_v43 = vld [vmem:[%s2498_s2 + $0xd48] sm:$0xff] }
  0x6a   : > { %v623_v45 = vld [vmem:[%s2498_s2 + $0x900] sm:$0xff]  ;;  %887 = vmatpush.msra.mxu1 %v503_v44  ;;  %v624_v44 = vld [vmem:[%s2498_s2 + $0x908] sm:$0xff] }
  0x6b   : > { %v751_v46 = vld [vmem:[%s2498_s2 + $0xd00] sm:$0xff]  ;;  %908 = vmatpush.msra.mxu2 %v623_v45  ;;  %v376_v45 = vld [vmem:[%s2498_s2 + $0x148] sm:$0xff] }
  0x6c   : > { %v367_v47 = vld [vmem:[%s2498_s2 + $0x100] sm:$0xff]  ;;  %928 = vmatpush.msra.mxu3 %v751_v46  ;;  %v2622_v46 = vld.sshfl [vmem:[#allocation1 + $0x10] sm:$0xff pattern:$0x73625140] }
  0x6d   : > { %v495_v48 = vld [vmem:[%s2498_s2 + $0x500] sm:$0xff]  ;;  %868 = vmatpush.msra.mxu0 %v367_v47  ;;  %v504_v47 = vld [vmem:[%s2498_s2 + $0x548] sm:$0xff] }
  0x6e   : > { %v615_v49 = vld [vmem:[%s2498_s2 + $0x8c0] sm:$0xff]  ;;  %888 = vmatpush.msra.mxu1 %v495_v48  ;;  %v616_v48 = vld [vmem:[%s2498_s2 + $0x8c8] sm:$0xff] }
  0x6f   : > { %v743_v50 = vld [vmem:[%s2498_s2 + $0xcc0] sm:$0xff]  ;;  %909 = vmatpush.msra.mxu2 %v615_v49  ;;  %v752_v49 = vld [vmem:[%s2498_s2 + $0xd08] sm:$0xff] }
  0x70   : > { %v359_v51 = vld [vmem:[%s2498_s2 + $0xc0] sm:$0xff]  ;;  %929 = vmatpush.msra.mxu3 %v743_v50  ;;  %v2627_v50 = vld.sshfl [vmem:[#allocation1 + $0x18] sm:$0xff pattern:$0x73625140] }
  0x71   : > { %v487_v52 = vld [vmem:[%s2498_s2 + $0x4c0] sm:$0xff]  ;;  %869 = vmatpush.msra.mxu0 %v359_v51  ;;  %v368_v51 = vld [vmem:[%s2498_s2 + $0x108] sm:$0xff] }
  0x72   : > { %v607_v53 = vld [vmem:[%s2498_s2 + $0x880] sm:$0xff]  ;;  %889 = vmatpush.msra.mxu1 %v487_v52  ;;  %v496_v52 = vld [vmem:[%s2498_s2 + $0x508] sm:$0xff] }
  0x73   : > { %v735_v54 = vld [vmem:[%s2498_s2 + $0xc80] sm:$0xff]  ;;  %910 = vmatpush.msra.mxu2 %v607_v53  ;;  %v608_v53 = vld [vmem:[%s2498_s2 + $0x888] sm:$0xff] }
  0x74   : > { %v351_v55 = vld [vmem:[%s2498_s2 + $0x80] sm:$0xff]  ;;  %930 = vmatpush.msra.mxu3 %v735_v54  ;;  %v744_v54 = vld [vmem:[%s2498_s2 + $0xcc8] sm:$0xff] }
  0x75   : > { %v479_v56 = vld [vmem:[%s2498_s2 + $0x480] sm:$0xff]  ;;  %870 = vmatpush.msra.mxu0 %v351_v55  ;;  %v2634_v55 = vld.sshfl [vmem:[#allocation1] sm:$0xff pattern:$0x73625140] }
  0x76   : > { %v599_v57 = vld [vmem:[%s2498_s2 + $0x840] sm:$0xff]  ;;  %890 = vmatpush.msra.mxu1 %v479_v56 }
  0x77   : > { %v727_v58 = vld [vmem:[%s2498_s2 + $0xc40] sm:$0xff]  ;;  %911 = vmatpush.msra.mxu2 %v599_v57  ;;  %v360_v57 = vld [vmem:[%s2498_s2 + $0xc8] sm:$0xff] }
  0x78   : > { %v343_v59 = vld [vmem:[%s2498_s2 + $0x40] sm:$0xff]  ;;  %931 = vmatpush.msra.mxu3 %v727_v58  ;;  %v488_v58 = vld [vmem:[%s2498_s2 + $0x4c8] sm:$0xff] }
  0x79   : > { %v471_v60 = vld [vmem:[%s2498_s2 + $0x440] sm:$0xff]  ;;  %871 = vmatpush.msra.mxu0 %v343_v59  ;;  %v600_v59 = vld [vmem:[%s2498_s2 + $0x848] sm:$0xff] }
  0x7a   : > { %v591_v61 = vld [vmem:[%s2498_s2 + $0x800] sm:$0xff]  ;;  %891 = vmatpush.msra.mxu1 %v471_v60  ;;  %v736_v60 = vld [vmem:[%s2498_s2 + $0xc88] sm:$0xff] }
  0x7b   : > { %v719_v62 = vld [vmem:[%s2498_s2 + $0xc00] sm:$0xff]  ;;  %912 = vmatpush.msra.mxu2 %v591_v61  ;;  %v352_v61 = vld [vmem:[%s2498_s2 + $0x88] sm:$0xff] }
  0x7c   : > { %v335_v1 = vld [vmem:[%s2498_s2] sm:$0xff]  ;;  %932 = vmatpush.msra.mxu3 %v719_v62  ;;  %913 = vmatmul.f32.vlgmr.msra.gmra.mxu2 %v2622_v46  ;;  %v480_v62 = vld [vmem:[%s2498_s2 + $0x488] sm:$0xff] }
  0x7d   : > { %v463_v2 = vld [vmem:[%s2498_s2 + $0x400] sm:$0xff]  ;;  %977 = vmatpush.msrb.mxu2 %v712_v63  ;;  %872 = vmatpush.msra.mxu0 %v335_v1  ;;  %v592_v63 = vld [vmem:[%s2498_s2 + $0x808] sm:$0xff]  ;;  %v713_v1 = vld [vmem:[%s2498_s2 + $0xbd0] sm:$0xff] }
  0x7e   : > { %997 = vmatpush.msrb.mxu3 %v840_v0  ;;  %892 = vmatpush.msra.mxu1 %v463_v2  ;;  %v2637_v56 = vld.sshfl [vmem:[#allocation1 + $0x8] sm:$0xff pattern:$0x73625140]  ;;  %v728_v0 = vld [vmem:[%s2498_s2 + $0xc48] sm:$0xff] }
  0x7f   : > { %978 = vmatpush.msrb.mxu2 %v704_v3  ;;  %937 = vmatpush.msrb.mxu0 %v456_v4  ;;  %v344_v2 = vld [vmem:[%s2498_s2 + $0x48] sm:$0xff] }
  0x80   : > { %957 = vmatpush.msrb.mxu1 %v584_v5  ;;  %998 = vmatpush.msrb.mxu3 %v832_v6  ;;  %v472_v3 = vld [vmem:[%s2498_s2 + $0x448] sm:$0xff]  ;;  %v705_v5 = vld [vmem:[%s2498_s2 + $0xb90] sm:$0xff] }
  0x81   : > { %979 = vmatpush.msrb.mxu2 %v696_v7  ;;  %938 = vmatpush.msrb.mxu0 %v448_v8  ;;  %v720_v4 = vld [vmem:[%s2498_s2 + $0xc08] sm:$0xff]  ;;  %v841_v6 = vld [vmem:[%s2498_s2 + $0xfd0] sm:$0xff] }
  0x82   : > { %958 = vmatpush.msrb.mxu1 %v576_v9  ;;  %999 = vmatpush.msrb.mxu3 %v824_v10  ;;  %v336_v7 = vld [vmem:[%s2498_s2 + $0x8] sm:$0xff]  ;;  %v457_v9 = vld [vmem:[%s2498_s2 + $0x3d0] sm:$0xff] }
  0x83   : > { %980 = vmatpush.msrb.mxu2 %v688_v11  ;;  %939 = vmatpush.msrb.mxu0 %v440_v12  ;;  %v464_v8 = vld [vmem:[%s2498_s2 + $0x408] sm:$0xff]  ;;  %v585_v10 = vld [vmem:[%s2498_s2 + $0x7d0] sm:$0xff] }
  0x84   : > { %959 = vmatpush.msrb.mxu1 %v568_v14  ;;  %1000 = vmatpush.msrb.mxu3 %v816_v15  ;;  %v697_v11 = vld [vmem:[%s2498_s2 + $0xb50] sm:$0xff] }
  0x85   : > { %981 = vmatpush.msrb.mxu2 %v680_v16  ;;  %940 = vmatpush.msrb.mxu0 %v432_v17  ;;  %v833_v12 = vld [vmem:[%s2498_s2 + $0xf90] sm:$0xff] }
  0x86   : > { %960 = vmatpush.msrb.mxu1 %v560_v18  ;;  %1001 = vmatpush.msrb.mxu3 %v808_v19  ;;  %v577_v14 = vld [vmem:[%s2498_s2 + $0x790] sm:$0xff] }
  0x87   : > { %982 = vmatpush.msrb.mxu2 %v672_v20  ;;  %941 = vmatpush.msrb.mxu0 %v424_v21  ;;  %v689_v15 = vld [vmem:[%s2498_s2 + $0xb10] sm:$0xff] }
  0x88   : > { %961 = vmatpush.msrb.mxu1 %v552_v22  ;;  %1002 = vmatpush.msrb.mxu3 %v800_v23  ;;  %v825_v16 = vld [vmem:[%s2498_s2 + $0xf50] sm:$0xff] }
  0x89   : > { %983 = vmatpush.msrb.mxu2 %v664_v24  ;;  %942 = vmatpush.msrb.mxu0 %v416_v25  ;;  %v441_v17 = vld [vmem:[%s2498_s2 + $0x350] sm:$0xff] }
  0x8a   : > { %962 = vmatpush.msrb.mxu1 %v544_v26  ;;  %1003 = vmatpush.msrb.mxu3 %v792_v27  ;;  %v569_v18 = vld [vmem:[%s2498_s2 + $0x750] sm:$0xff] }
  0x8b   : > { %984 = vmatpush.msrb.mxu2 %v656_v28  ;;  %943 = vmatpush.msrb.mxu0 %v408_v29  ;;  %v681_v19 = vld [vmem:[%s2498_s2 + $0xad0] sm:$0xff] }
  0x8c   : > { %963 = vmatpush.msrb.mxu1 %v536_v30  ;;  %1004 = vmatpush.msrb.mxu3 %v784_v31  ;;  %v817_v20 = vld [vmem:[%s2498_s2 + $0xf10] sm:$0xff] }
  0x8d   : > { %985 = vmatpush.msrb.mxu2 %v648_v32  ;;  %944 = vmatpush.msrb.mxu0 %v400_v33  ;;  %v433_v21 = vld [vmem:[%s2498_s2 + $0x310] sm:$0xff] }
  0x8e   : > { %964 = vmatpush.msrb.mxu1 %v528_v34  ;;  %1005 = vmatpush.msrb.mxu3 %v776_v35  ;;  %v561_v22 = vld [vmem:[%s2498_s2 + $0x710] sm:$0xff] }
  0x8f   : > { %986 = vmatpush.msrb.mxu2 %v640_v36  ;;  %945 = vmatpush.msrb.mxu0 %v392_v37  ;;  %v673_v23 = vld [vmem:[%s2498_s2 + $0xa90] sm:$0xff] }
  0x90   : > { %965 = vmatpush.msrb.mxu1 %v520_v38  ;;  %1006 = vmatpush.msrb.mxu3 %v768_v39  ;;  %v809_v24 = vld [vmem:[%s2498_s2 + $0xed0] sm:$0xff] }
  0x91   : > { %987 = vmatpush.msrb.mxu2 %v632_v40  ;;  %946 = vmatpush.msrb.mxu0 %v384_v41  ;;  %v425_v25 = vld [vmem:[%s2498_s2 + $0x2d0] sm:$0xff] }
  0x92   : > { %966 = vmatpush.msrb.mxu1 %v512_v42  ;;  %1007 = vmatpush.msrb.mxu3 %v760_v43  ;;  %v553_v26 = vld [vmem:[%s2498_s2 + $0x6d0] sm:$0xff] }
  0x93   : > { %988 = vmatpush.msrb.mxu2 %v624_v44  ;;  %947 = vmatpush.msrb.mxu0 %v376_v45  ;;  %v665_v27 = vld [vmem:[%s2498_s2 + $0xa50] sm:$0xff] }
  0x94   : > { %967 = vmatpush.msrb.mxu1 %v504_v47  ;;  %1008 = vmatpush.msrb.mxu3 %v752_v49  ;;  %v801_v28 = vld [vmem:[%s2498_s2 + $0xe90] sm:$0xff] }
  0x95   : > { %989 = vmatpush.msrb.mxu2 %v616_v48  ;;  %933 = vmatmul.f32.vlgmr.msra.gmra.mxu3 %v2627_v50  ;;  %v417_v29 = vld [vmem:[%s2498_s2 + $0x290] sm:$0xff] }
  0x96   : > { %948 = vmatpush.msrb.mxu0 %v368_v51  ;;  %968 = vmatpush.msrb.mxu1 %v496_v52  ;;  %v545_v30 = vld [vmem:[%s2498_s2 + $0x690] sm:$0xff] }
  0x97   : > { %990 = vmatpush.msrb.mxu2 %v608_v53  ;;  %1009 = vmatpush.msrb.mxu3 %v744_v54  ;;  %v657_v31 = vld [vmem:[%s2498_s2 + $0xa10] sm:$0xff] }
  0x98   : > { %873 = vmatmul.f32.vlgmr.msra.gmra.mxu0 %v2634_v55  ;;  %893 = vmatmul.f32.vlgmr.msra.gmra.mxu1 %v2637_v56  ;;  %v793_v32 = vld [vmem:[%s2498_s2 + $0xe50] sm:$0xff] }
  0x99   : > { %949 = vmatpush.msrb.mxu0 %v360_v57  ;;  %969 = vmatpush.msrb.mxu1 %v488_v58  ;;  %v409_v33 = vld [vmem:[%s2498_s2 + $0x250] sm:$0xff] }
  0x9a   : > { %991 = vmatpush.msrb.mxu2 %v600_v59  ;;  %1010 = vmatpush.msrb.mxu3 %v736_v60  ;;  %v537_v34 = vld [vmem:[%s2498_s2 + $0x650] sm:$0xff] }
  0x9b   : > { %950 = vmatpush.msrb.mxu0 %v352_v61  ;;  %970 = vmatpush.msrb.mxu1 %v480_v62  ;;  %v649_v35 = vld [vmem:[%s2498_s2 + $0x9d0] sm:$0xff] }
  0x9c   : > { %992 = vmatpush.msrb.mxu2 %v592_v63  ;;  %1011 = vmatpush.msrb.mxu3 %v728_v0  ;;  %v785_v36 = vld [vmem:[%s2498_s2 + $0xe10] sm:$0xff] }
  0x9d   : > { %993 = vmatmul.f32.vlgmr.msrb.gmra.mxu2 %v2622_v46  ;;  %951 = vmatpush.msrb.mxu0 %v344_v2  ;;  %v401_v37 = vld [vmem:[%s2498_s2 + $0x210] sm:$0xff] }
  0x9e   : > { %1057 = vmatpush.msra.mxu2 %v713_v1  ;;  %971 = vmatpush.msrb.mxu1 %v472_v3  ;;  %v529_v38 = vld [vmem:[%s2498_s2 + $0x610] sm:$0xff] }
  0x9f   : > { %1012 = vmatpush.msrb.mxu3 %v720_v4  ;;  %952 = vmatpush.msrb.mxu0 %v336_v7  ;;  %v641_v39 = vld [vmem:[%s2498_s2 + $0x990] sm:$0xff] }
  0xa0   : > { %1013 = vmatmul.f32.vlgmr.msrb.gmra.mxu3 %v2627_v50  ;;  %1058 = vmatpush.msra.mxu2 %v705_v5  ;;  %v777_v40 = vld [vmem:[%s2498_s2 + $0xdd0] sm:$0xff]  ;;  %v714_v5 = vld [vmem:[%s2498_s2 + $0xbd8] sm:$0xff] }
  0xa1   : > { %1077 = vmatpush.msra.mxu3 %v841_v6  ;;  %972 = vmatpush.msrb.mxu1 %v464_v8  ;;  %v393_v41 = vld [vmem:[%s2498_s2 + $0x1d0] sm:$0xff] }
  0xa2   : > { %953 = vmatmul.f32.vlgmr.msrb.gmra.mxu0 %v2634_v55  ;;  %973 = vmatmul.f32.vlgmr.msrb.gmra.mxu1 %v2637_v56  ;;  %v521_v42 = vld [vmem:[%s2498_s2 + $0x5d0] sm:$0xff] }
  0xa3   : > { %1017 = vmatpush.msra.mxu0 %v457_v9  ;;  %1037 = vmatpush.msra.mxu1 %v585_v10  ;;  %v633_v43 = vld [vmem:[%s2498_s2 + $0x950] sm:$0xff]  ;;  %v706_v9 = vld [vmem:[%s2498_s2 + $0xb98] sm:$0xff] }
  0xa4   : > { %1059 = vmatpush.msra.mxu2 %v697_v11  ;;  %1078 = vmatpush.msra.mxu3 %v833_v12  ;;  %v769_v44 = vld [vmem:[%s2498_s2 + $0xd90] sm:$0xff]  ;;  %v842_v10 = vld [vmem:[%s2498_s2 + $0xfd8] sm:$0xff] }
  0xa5   : > { %1018 = vmatpush.msra.mxu0 %v449_v13  ;;  %1038 = vmatpush.msra.mxu1 %v577_v14  ;;  %v385_v45 = vld [vmem:[%s2498_s2 + $0x190] sm:$0xff]  ;;  %v458_v13 = vld [vmem:[%s2498_s2 + $0x3d8] sm:$0xff] }
  0xa6   : > { %1060 = vmatpush.msra.mxu2 %v689_v15  ;;  %1079 = vmatpush.msra.mxu3 %v825_v16  ;;  %v513_v47 = vld [vmem:[%s2498_s2 + $0x590] sm:$0xff]  ;;  %v586_v14 = vld [vmem:[%s2498_s2 + $0x7d8] sm:$0xff] }
  0xa7   : > { %1019 = vmatpush.msra.mxu0 %v441_v17  ;;  %1039 = vmatpush.msra.mxu1 %v569_v18  ;;  %v625_v48 = vld [vmem:[%s2498_s2 + $0x910] sm:$0xff]  ;;  %v698_v15 = vld [vmem:[%s2498_s2 + $0xb58] sm:$0xff] }
  0xa8   : > { %1061 = vmatpush.msra.mxu2 %v681_v19  ;;  %1080 = vmatpush.msra.mxu3 %v817_v20  ;;  %v761_v49 = vld [vmem:[%s2498_s2 + $0xd50] sm:$0xff]  ;;  %v834_v16 = vld [vmem:[%s2498_s2 + $0xf98] sm:$0xff] }
  0xa9   : > { %1020 = vmatpush.msra.mxu0 %v433_v21  ;;  %1040 = vmatpush.msra.mxu1 %v561_v22  ;;  %v377_v51 = vld [vmem:[%s2498_s2 + $0x150] sm:$0xff]  ;;  %v450_v17 = vld [vmem:[%s2498_s2 + $0x398] sm:$0xff] }
  0xaa   : > { %1062 = vmatpush.msra.mxu2 %v673_v23  ;;  %1081 = vmatpush.msra.mxu3 %v809_v24  ;;  %v505_v52 = vld [vmem:[%s2498_s2 + $0x550] sm:$0xff]  ;;  %v578_v18 = vld [vmem:[%s2498_s2 + $0x798] sm:$0xff] }
  0xab   : > { %1021 = vmatpush.msra.mxu0 %v425_v25  ;;  %1041 = vmatpush.msra.mxu1 %v553_v26  ;;  %v617_v53 = vld [vmem:[%s2498_s2 + $0x8d0] sm:$0xff]  ;;  %v690_v19 = vld [vmem:[%s2498_s2 + $0xb18] sm:$0xff] }
  0xac   : > { %1063 = vmatpush.msra.mxu2 %v665_v27  ;;  %1082 = vmatpush.msra.mxu3 %v801_v28  ;;  %v753_v54 = vld [vmem:[%s2498_s2 + $0xd10] sm:$0xff]  ;;  %v826_v20 = vld [vmem:[%s2498_s2 + $0xf58] sm:$0xff] }
  0xad   : > { %1022 = vmatpush.msra.mxu0 %v417_v29  ;;  %1042 = vmatpush.msra.mxu1 %v545_v30  ;;  %v369_v57 = vld [vmem:[%s2498_s2 + $0x110] sm:$0xff]  ;;  %v442_v21 = vld [vmem:[%s2498_s2 + $0x358] sm:$0xff] }
  0xae   : > { %1064 = vmatpush.msra.mxu2 %v657_v31  ;;  %1083 = vmatpush.msra.mxu3 %v793_v32  ;;  %v497_v58 = vld [vmem:[%s2498_s2 + $0x510] sm:$0xff]  ;;  %v570_v22 = vld [vmem:[%s2498_s2 + $0x758] sm:$0xff] }
  0xaf   : > { %1023 = vmatpush.msra.mxu0 %v409_v33  ;;  %1043 = vmatpush.msra.mxu1 %v537_v34  ;;  %v609_v59 = vld [vmem:[%s2498_s2 + $0x890] sm:$0xff]  ;;  %v682_v23 = vld [vmem:[%s2498_s2 + $0xad8] sm:$0xff] }
  0xb0   : > { %1065 = vmatpush.msra.mxu2 %v649_v35  ;;  %1084 = vmatpush.msra.mxu3 %v785_v36  ;;  %v745_v60 = vld [vmem:[%s2498_s2 + $0xcd0] sm:$0xff]  ;;  %v818_v24 = vld [vmem:[%s2498_s2 + $0xf18] sm:$0xff] }
  0xb1   : > { %1024 = vmatpush.msra.mxu0 %v401_v37  ;;  %1044 = vmatpush.msra.mxu1 %v529_v38  ;;  %v361_v61 = vld [vmem:[%s2498_s2 + $0xd0] sm:$0xff]  ;;  %v434_v25 = vld [vmem:[%s2498_s2 + $0x318] sm:$0xff] }
  0xb2   : > { %1066 = vmatpush.msra.mxu2 %v641_v39  ;;  %1085 = vmatpush.msra.mxu3 %v777_v40  ;;  %v489_v62 = vld [vmem:[%s2498_s2 + $0x4d0] sm:$0xff]  ;;  %v562_v26 = vld [vmem:[%s2498_s2 + $0x718] sm:$0xff] }
  0xb3   : > { %1025 = vmatpush.msra.mxu0 %v393_v41  ;;  %1045 = vmatpush.msra.mxu1 %v521_v42  ;;  %v601_v63 = vld [vmem:[%s2498_s2 + $0x850] sm:$0xff]  ;;  %v674_v27 = vld [vmem:[%s2498_s2 + $0xa98] sm:$0xff] }
  0xb4   : > { %1067 = vmatpush.msra.mxu2 %v633_v43  ;;  %1086 = vmatpush.msra.mxu3 %v769_v44  ;;  %v737_v0 = vld [vmem:[%s2498_s2 + $0xc90] sm:$0xff]  ;;  %v810_v28 = vld [vmem:[%s2498_s2 + $0xed8] sm:$0xff] }
  0xb5   : > { %1026 = vmatpush.msra.mxu0 %v385_v45  ;;  %1046 = vmatpush.msra.mxu1 %v513_v47  ;;  %v353_v1 = vld [vmem:[%s2498_s2 + $0x90] sm:$0xff]  ;;  %v426_v29 = vld [vmem:[%s2498_s2 + $0x2d8] sm:$0xff] }
  0xb6   : > { %1068 = vmatpush.msra.mxu2 %v625_v48  ;;  %1087 = vmatpush.msra.mxu3 %v761_v49  ;;  %v481_v2 = vld [vmem:[%s2498_s2 + $0x490] sm:$0xff]  ;;  %v554_v30 = vld [vmem:[%s2498_s2 + $0x6d8] sm:$0xff] }
  0xb7   : > { %1027 = vmatpush.msra.mxu0 %v377_v51  ;;  %1047 = vmatpush.msra.mxu1 %v505_v52  ;;  %v593_v3 = vld [vmem:[%s2498_s2 + $0x810] sm:$0xff]  ;;  %v666_v31 = vld [vmem:[%s2498_s2 + $0xa58] sm:$0xff] }
  0xb8   : > { %1069 = vmatpush.msra.mxu2 %v617_v53  ;;  %1088 = vmatpush.msra.mxu3 %v753_v54  ;;  %v729_v4 = vld [vmem:[%s2498_s2 + $0xc50] sm:$0xff]  ;;  %v802_v32 = vld [vmem:[%s2498_s2 + $0xe98] sm:$0xff] }
  0xb9   : > { %1028 = vmatpush.msra.mxu0 %v369_v57  ;;  %1048 = vmatpush.msra.mxu1 %v497_v58  ;;  %v345_v6 = vld [vmem:[%s2498_s2 + $0x50] sm:$0xff]  ;;  %v418_v33 = vld [vmem:[%s2498_s2 + $0x298] sm:$0xff] }
  0xba   : > { %1070 = vmatpush.msra.mxu2 %v609_v59  ;;  %1089 = vmatpush.msra.mxu3 %v745_v60  ;;  %v473_v7 = vld [vmem:[%s2498_s2 + $0x450] sm:$0xff]  ;;  %v546_v34 = vld [vmem:[%s2498_s2 + $0x698] sm:$0xff] }
  0xbb   : > { %1029 = vmatpush.msra.mxu0 %v361_v61  ;;  %1049 = vmatpush.msra.mxu1 %v489_v62  ;;  %v721_v8 = vld [vmem:[%s2498_s2 + $0xc10] sm:$0xff]  ;;  %v658_v35 = vld [vmem:[%s2498_s2 + $0xa18] sm:$0xff] }
  0xbc   : > { %1071 = vmatpush.msra.mxu2 %v601_v63  ;;  %1090 = vmatpush.msra.mxu3 %v737_v0  ;;  %v337_v11 = vld [vmem:[%s2498_s2 + $0x10] sm:$0xff]  ;;  %v794_v36 = vld [vmem:[%s2498_s2 + $0xe58] sm:$0xff] }
  0xbd   : > { %1030 = vmatpush.msra.mxu0 %v353_v1  ;;  %1050 = vmatpush.msra.mxu1 %v481_v2  ;;  %v465_v12 = vld [vmem:[%s2498_s2 + $0x410] sm:$0xff]  ;;  %v410_v37 = vld [vmem:[%s2498_s2 + $0x258] sm:$0xff] }
  0xbe   : > { %1072 = vmatpush.msra.mxu2 %v593_v3  ;;  %1091 = vmatpush.msra.mxu3 %v729_v4  ;;  %v538_v38 = vld [vmem:[%s2498_s2 + $0x658] sm:$0xff] }
  0xbf   : > { %1031 = vmatpush.msra.mxu0 %v345_v6  ;;  %1051 = vmatpush.msra.mxu1 %v473_v7  ;;  %v650_v39 = vld [vmem:[%s2498_s2 + $0x9d8] sm:$0xff] }
  0xc0   : > { %1137 = vmatpush.msrb.mxu2 %v714_v5  ;;  %1092 = vmatpush.msra.mxu3 %v721_v8  ;;  %v786_v40 = vld [vmem:[%s2498_s2 + $0xe18] sm:$0xff] }
  0xc1   : > { %1032 = vmatpush.msra.mxu0 %v337_v11  ;;  %1052 = vmatpush.msra.mxu1 %v465_v12  ;;  %v402_v41 = vld [vmem:[%s2498_s2 + $0x218] sm:$0xff] }
  0xc2   : > { %1138 = vmatpush.msrb.mxu2 %v706_v9  ;;  %1157 = vmatpush.msrb.mxu3 %v842_v10  ;;  %v530_v42 = vld [vmem:[%s2498_s2 + $0x618] sm:$0xff]  ;;  %v715_v9 = vld [vmem:[%s2498_s2 + $0xbe0] sm:$0xff] }
  0xc3   : > { %1097 = vmatpush.msrb.mxu0 %v458_v13  ;;  %1117 = vmatpush.msrb.mxu1 %v586_v14  ;;  %v642_v43 = vld [vmem:[%s2498_s2 + $0x998] sm:$0xff]  ;;  %v707_v13 = vld [vmem:[%s2498_s2 + $0xba0] sm:$0xff] }
  0xc4   : > { %1139 = vmatpush.msrb.mxu2 %v698_v15  ;;  %1158 = vmatpush.msrb.mxu3 %v834_v16  ;;  %v778_v44 = vld [vmem:[%s2498_s2 + $0xdd8] sm:$0xff]  ;;  %v843_v14 = vld [vmem:[%s2498_s2 + $0xfe0] sm:$0xff] }
  0xc5   : > { %1098 = vmatpush.msrb.mxu0 %v450_v17  ;;  %1118 = vmatpush.msrb.mxu1 %v578_v18  ;;  %v394_v45 = vld [vmem:[%s2498_s2 + $0x1d8] sm:$0xff]  ;;  %v459_v17 = vld [vmem:[%s2498_s2 + $0x3e0] sm:$0xff] }
  0xc6   : > { %1140 = vmatpush.msrb.mxu2 %v690_v19  ;;  %1159 = vmatpush.msrb.mxu3 %v826_v20  ;;  %v522_v47 = vld [vmem:[%s2498_s2 + $0x5d8] sm:$0xff]  ;;  %v699_v18 = vld [vmem:[%s2498_s2 + $0xb60] sm:$0xff] }
  0xc7   : > { %1099 = vmatpush.msrb.mxu0 %v442_v21  ;;  %1119 = vmatpush.msrb.mxu1 %v570_v22  ;;  %v634_v48 = vld [vmem:[%s2498_s2 + $0x958] sm:$0xff]  ;;  %v835_v19 = vld [vmem:[%s2498_s2 + $0xfa0] sm:$0xff] }
  0xc8   : > { %1141 = vmatpush.msrb.mxu2 %v682_v23  ;;  %1160 = vmatpush.msrb.mxu3 %v818_v24  ;;  %v770_v49 = vld [vmem:[%s2498_s2 + $0xd98] sm:$0xff]  ;;  %v451_v20 = vld [vmem:[%s2498_s2 + $0x3a0] sm:$0xff] }
  0xc9   : > { %1100 = vmatpush.msrb.mxu0 %v434_v25  ;;  %1120 = vmatpush.msrb.mxu1 %v562_v26  ;;  %v386_v51 = vld [vmem:[%s2498_s2 + $0x198] sm:$0xff]  ;;  %v691_v21 = vld [vmem:[%s2498_s2 + $0xb20] sm:$0xff] }
  0xca   : > { %1142 = vmatpush.msrb.mxu2 %v674_v27  ;;  %1161 = vmatpush.msrb.mxu3 %v810_v28  ;;  %v514_v52 = vld [vmem:[%s2498_s2 + $0x598] sm:$0xff]  ;;  %v827_v22 = vld [vmem:[%s2498_s2 + $0xf60] sm:$0xff] }
  0xcb   : > { %1101 = vmatpush.msrb.mxu0 %v426_v29  ;;  %1121 = vmatpush.msrb.mxu1 %v554_v30  ;;  %v626_v53 = vld [vmem:[%s2498_s2 + $0x918] sm:$0xff]  ;;  %v443_v23 = vld [vmem:[%s2498_s2 + $0x360] sm:$0xff] }
  0xcc   : > { %1143 = vmatpush.msrb.mxu2 %v666_v31  ;;  %1162 = vmatpush.msrb.mxu3 %v802_v32  ;;  %v762_v54 = vld [vmem:[%s2498_s2 + $0xd58] sm:$0xff]  ;;  %v683_v24 = vld [vmem:[%s2498_s2 + $0xae0] sm:$0xff] }
  0xcd   : > { %1102 = vmatpush.msrb.mxu0 %v418_v33  ;;  %1122 = vmatpush.msrb.mxu1 %v546_v34  ;;  %v378_v57 = vld [vmem:[%s2498_s2 + $0x158] sm:$0xff]  ;;  %v435_v25 = vld [vmem:[%s2498_s2 + $0x320] sm:$0xff] }
  0xce   : > { %1144 = vmatpush.msrb.mxu2 %v658_v35  ;;  %1163 = vmatpush.msrb.mxu3 %v794_v36  ;;  %v506_v58 = vld [vmem:[%s2498_s2 + $0x558] sm:$0xff]  ;;  %v563_v26 = vld [vmem:[%s2498_s2 + $0x720] sm:$0xff] }
  0xcf   : > { %1103 = vmatpush.msrb.mxu0 %v410_v37  ;;  %1123 = vmatpush.msrb.mxu1 %v538_v38  ;;  %v618_v59 = vld [vmem:[%s2498_s2 + $0x8d8] sm:$0xff]  ;;  %v675_v27 = vld [vmem:[%s2498_s2 + $0xaa0] sm:$0xff] }
  0xd0   : > { %1145 = vmatpush.msrb.mxu2 %v650_v39  ;;  %1164 = vmatpush.msrb.mxu3 %v786_v40  ;;  %v754_v60 = vld [vmem:[%s2498_s2 + $0xd18] sm:$0xff]  ;;  %v811_v28 = vld [vmem:[%s2498_s2 + $0xee0] sm:$0xff] }
  0xd1   : > { %1104 = vmatpush.msrb.mxu0 %v402_v41  ;;  %1124 = vmatpush.msrb.mxu1 %v530_v42  ;;  %v370_v61 = vld [vmem:[%s2498_s2 + $0x118] sm:$0xff]  ;;  %v427_v29 = vld [vmem:[%s2498_s2 + $0x2e0] sm:$0xff] }
  0xd2   : > { %1146 = vmatpush.msrb.mxu2 %v642_v43  ;;  %1165 = vmatpush.msrb.mxu3 %v778_v44  ;;  %v498_v62 = vld [vmem:[%s2498_s2 + $0x518] sm:$0xff]  ;;  %v555_v30 = vld [vmem:[%s2498_s2 + $0x6e0] sm:$0xff] }
  0xd3   : > { %1105 = vmatpush.msrb.mxu0 %v394_v45  ;;  %1125 = vmatpush.msrb.mxu1 %v522_v47  ;;  %v610_v63 = vld [vmem:[%s2498_s2 + $0x898] sm:$0xff]  ;;  %v667_v31 = vld [vmem:[%s2498_s2 + $0xa60] sm:$0xff] }
  0xd4   : > { %1147 = vmatpush.msrb.mxu2 %v634_v48  ;;  %1166 = vmatpush.msrb.mxu3 %v770_v49  ;;  %v746_v0 = vld [vmem:[%s2498_s2 + $0xcd8] sm:$0xff]  ;;  %v803_v32 = vld [vmem:[%s2498_s2 + $0xea0] sm:$0xff] }
  0xd5   : > { %1106 = vmatpush.msrb.mxu0 %v386_v51  ;;  %1126 = vmatpush.msrb.mxu1 %v514_v52  ;;  %v362_v1 = vld [vmem:[%s2498_s2 + $0xd8] sm:$0xff]  ;;  %v419_v33 = vld [vmem:[%s2498_s2 + $0x2a0] sm:$0xff] }
  0xd6   : > { %1148 = vmatpush.msrb.mxu2 %v626_v53  ;;  %1167 = vmatpush.msrb.mxu3 %v762_v54  ;;  %v490_v2 = vld [vmem:[%s2498_s2 + $0x4d8] sm:$0xff]  ;;  %v547_v34 = vld [vmem:[%s2498_s2 + $0x6a0] sm:$0xff] }
  0xd7   : > { %1073 = vmatmul.f32.vlgmr.msra.gmra.mxu2 %v2622_v46  ;;  %1107 = vmatpush.msrb.mxu0 %v378_v57  ;;  %v602_v3 = vld [vmem:[%s2498_s2 + $0x858] sm:$0xff]  ;;  %v659_v35 = vld [vmem:[%s2498_s2 + $0xa20] sm:$0xff] }
  0xd8   : > { %1127 = vmatpush.msrb.mxu1 %v506_v58  ;;  %1149 = vmatpush.msrb.mxu2 %v618_v59  ;;  %v738_v4 = vld [vmem:[%s2498_s2 + $0xc98] sm:$0xff]  ;;  %v795_v36 = vld [vmem:[%s2498_s2 + $0xe60] sm:$0xff] }
  0xd9   : > { %1168 = vmatpush.msrb.mxu3 %v754_v60  ;;  %1108 = vmatpush.msrb.mxu0 %v370_v61  ;;  %v354_v5 = vld [vmem:[%s2498_s2 + $0x98] sm:$0xff]  ;;  %v411_v37 = vld [vmem:[%s2498_s2 + $0x260] sm:$0xff] }
  0xda   : > { %1093 = vmatmul.f32.vlgmr.msra.gmra.mxu3 %v2627_v50  ;;  %1128 = vmatpush.msrb.mxu1 %v498_v62  ;;  %v482_v6 = vld [vmem:[%s2498_s2 + $0x498] sm:$0xff]  ;;  %v539_v38 = vld [vmem:[%s2498_s2 + $0x660] sm:$0xff] }
  0xdb   : > { %1150 = vmatpush.msrb.mxu2 %v610_v63  ;;  %1169 = vmatpush.msrb.mxu3 %v746_v0  ;;  %v594_v7 = vld [vmem:[%s2498_s2 + $0x818] sm:$0xff]  ;;  %v651_v39 = vld [vmem:[%s2498_s2 + $0x9e0] sm:$0xff] }
  0xdc   : > { %1033 = vmatmul.f32.vlgmr.msra.gmra.mxu0 %v2634_v55  ;;  %1053 = vmatmul.f32.vlgmr.msra.gmra.mxu1 %v2637_v56  ;;  %v730_v8 = vld [vmem:[%s2498_s2 + $0xc58] sm:$0xff]  ;;  %v787_v40 = vld [vmem:[%s2498_s2 + $0xe20] sm:$0xff] }
  0xdd   : > { %1109 = vmatpush.msrb.mxu0 %v362_v1  ;;  %1129 = vmatpush.msrb.mxu1 %v490_v2  ;;  %v346_v10 = vld [vmem:[%s2498_s2 + $0x58] sm:$0xff]  ;;  %v403_v41 = vld [vmem:[%s2498_s2 + $0x220] sm:$0xff] }
  0xde   : > { %1151 = vmatpush.msrb.mxu2 %v602_v3  ;;  %1170 = vmatpush.msrb.mxu3 %v738_v4  ;;  %v474_v11 = vld [vmem:[%s2498_s2 + $0x458] sm:$0xff]  ;;  %v531_v42 = vld [vmem:[%s2498_s2 + $0x620] sm:$0xff] }
  0xdf   : > { %1110 = vmatpush.msrb.mxu0 %v354_v5  ;;  %1130 = vmatpush.msrb.mxu1 %v482_v6  ;;  %v722_v12 = vld [vmem:[%s2498_s2 + $0xc18] sm:$0xff]  ;;  %v643_v43 = vld [vmem:[%s2498_s2 + $0x9a0] sm:$0xff] }
  0xe0   : > { %1152 = vmatpush.msrb.mxu2 %v594_v7  ;;  %1171 = vmatpush.msrb.mxu3 %v730_v8  ;;  %v338_v15 = vld [vmem:[%s2498_s2 + $0x18] sm:$0xff]  ;;  %v779_v44 = vld [vmem:[%s2498_s2 + $0xde0] sm:$0xff] }
  0xe1   : > { %1153 = vmatmul.f32.vlgmr.msrb.gmra.mxu2 %v2622_v46  ;;  %1111 = vmatpush.msrb.mxu0 %v346_v10  ;;  %v466_v16 = vld [vmem:[%s2498_s2 + $0x418] sm:$0xff]  ;;  %v587_v46 = vld [vmem:[%s2498_s2 + $0x7e0] sm:$0xff] }
  0xe2   : > { %1217 = vmatpush.msra.mxu2 %v715_v9  ;;  %1131 = vmatpush.msrb.mxu1 %v474_v11  ;;  %v395_v45 = vld [vmem:[%s2498_s2 + $0x1e0] sm:$0xff]  ;;  %v716_v9 = vld [vmem:[%s2498_s2 + $0xbe8] sm:$0xff] }
  0xe3   : > { %1172 = vmatpush.msrb.mxu3 %v722_v12  ;;  %1112 = vmatpush.msrb.mxu0 %v338_v15  ;;  %v523_v47 = vld [vmem:[%s2498_s2 + $0x5e0] sm:$0xff] }
  0xe4   : > { %1173 = vmatmul.f32.vlgmr.msrb.gmra.mxu3 %v2627_v50  ;;  %1218 = vmatpush.msra.mxu2 %v707_v13  ;;  %v579_v50 = vld [vmem:[%s2498_s2 + $0x7a0] sm:$0xff]  ;;  %v708_v13 = vld [vmem:[%s2498_s2 + $0xba8] sm:$0xff] }
  0xe5   : > { %1237 = vmatpush.msra.mxu3 %v843_v14  ;;  %1132 = vmatpush.msrb.mxu1 %v466_v16  ;;  %v635_v48 = vld [vmem:[%s2498_s2 + $0x960] sm:$0xff]  ;;  %v844_v14 = vld [vmem:[%s2498_s2 + $0xfe8] sm:$0xff] }
  0xe6   : > { %1113 = vmatmul.f32.vlgmr.msrb.gmra.mxu0 %v2634_v55  ;;  %1133 = vmatmul.f32.vlgmr.msrb.gmra.mxu1 %v2637_v56  ;;  %v571_v55 = vld [vmem:[%s2498_s2 + $0x760] sm:$0xff] }
  0xe7   : > { %1177 = vmatpush.msra.mxu0 %v459_v17  ;;  %1197 = vmatpush.msra.mxu1 %v587_v46  ;;  %v819_v56 = vld [vmem:[%s2498_s2 + $0xf20] sm:$0xff]  ;;  %v460_v17 = vld [vmem:[%s2498_s2 + $0x3e8] sm:$0xff] }
  0xe8   : > { %1219 = vmatpush.msra.mxu2 %v699_v18  ;;  %1238 = vmatpush.msra.mxu3 %v835_v19  ;;  %v771_v49 = vld [vmem:[%s2498_s2 + $0xda0] sm:$0xff]  ;;  %v588_v46 = vld [vmem:[%s2498_s2 + $0x7e8] sm:$0xff] }
  0xe9   : > { %1178 = vmatpush.msra.mxu0 %v451_v20  ;;  %1198 = vmatpush.msra.mxu1 %v579_v50  ;;  %v387_v51 = vld [vmem:[%s2498_s2 + $0x1a0] sm:$0xff]  ;;  %v700_v18 = vld [vmem:[%s2498_s2 + $0xb68] sm:$0xff] }
  0xea   : > { %1220 = vmatpush.msra.mxu2 %v691_v21  ;;  %1239 = vmatpush.msra.mxu3 %v827_v22  ;;  %v515_v52 = vld [vmem:[%s2498_s2 + $0x5a0] sm:$0xff]  ;;  %v836_v19 = vld [vmem:[%s2498_s2 + $0xfa8] sm:$0xff] }
  0xeb   : > { %1179 = vmatpush.msra.mxu0 %v443_v23  ;;  %1199 = vmatpush.msra.mxu1 %v571_v55  ;;  %v627_v53 = vld [vmem:[%s2498_s2 + $0x920] sm:$0xff]  ;;  %v452_v20 = vld [vmem:[%s2498_s2 + $0x3a8] sm:$0xff] }
  0xec   : > { %1221 = vmatpush.msra.mxu2 %v683_v24  ;;  %1240 = vmatpush.msra.mxu3 %v819_v56  ;;  %v763_v54 = vld [vmem:[%s2498_s2 + $0xd60] sm:$0xff]  ;;  %v580_v50 = vld [vmem:[%s2498_s2 + $0x7a8] sm:$0xff] }
  0xed   : > { %1180 = vmatpush.msra.mxu0 %v435_v25  ;;  %1200 = vmatpush.msra.mxu1 %v563_v26  ;;  %v379_v57 = vld [vmem:[%s2498_s2 + $0x160] sm:$0xff]  ;;  %v692_v21 = vld [vmem:[%s2498_s2 + $0xb28] sm:$0xff] }
  0xee   : > { %1222 = vmatpush.msra.mxu2 %v675_v27  ;;  %1241 = vmatpush.msra.mxu3 %v811_v28  ;;  %v507_v58 = vld [vmem:[%s2498_s2 + $0x560] sm:$0xff]  ;;  %v828_v22 = vld [vmem:[%s2498_s2 + $0xf68] sm:$0xff] }
  0xef   : > { %1181 = vmatpush.msra.mxu0 %v427_v29  ;;  %1201 = vmatpush.msra.mxu1 %v555_v30  ;;  %v619_v59 = vld [vmem:[%s2498_s2 + $0x8e0] sm:$0xff]  ;;  %v444_v23 = vld [vmem:[%s2498_s2 + $0x368] sm:$0xff] }
  0xf0   : > { %1223 = vmatpush.msra.mxu2 %v667_v31  ;;  %1242 = vmatpush.msra.mxu3 %v803_v32  ;;  %v755_v60 = vld [vmem:[%s2498_s2 + $0xd20] sm:$0xff]  ;;  %v572_v55 = vld [vmem:[%s2498_s2 + $0x768] sm:$0xff] }
  0xf1   : > { %1182 = vmatpush.msra.mxu0 %v419_v33  ;;  %1202 = vmatpush.msra.mxu1 %v547_v34  ;;  %v371_v61 = vld [vmem:[%s2498_s2 + $0x120] sm:$0xff]  ;;  %v684_v24 = vld [vmem:[%s2498_s2 + $0xae8] sm:$0xff] }
  0xf2   : > { %1224 = vmatpush.msra.mxu2 %v659_v35  ;;  %1243 = vmatpush.msra.mxu3 %v795_v36  ;;  %v499_v62 = vld [vmem:[%s2498_s2 + $0x520] sm:$0xff]  ;;  %v820_v56 = vld [vmem:[%s2498_s2 + $0xf28] sm:$0xff] }
  0xf3   : > { %1183 = vmatpush.msra.mxu0 %v411_v37  ;;  %1203 = vmatpush.msra.mxu1 %v539_v38  ;;  %v611_v63 = vld [vmem:[%s2498_s2 + $0x8a0] sm:$0xff]  ;;  %v436_v25 = vld [vmem:[%s2498_s2 + $0x328] sm:$0xff] }
  0xf4   : > { %1225 = vmatpush.msra.mxu2 %v651_v39  ;;  %1244 = vmatpush.msra.mxu3 %v787_v40  ;;  %v747_v0 = vld [vmem:[%s2498_s2 + $0xce0] sm:$0xff]  ;;  %v564_v26 = vld [vmem:[%s2498_s2 + $0x728] sm:$0xff] }
  0xf5   : > { %1184 = vmatpush.msra.mxu0 %v403_v41  ;;  %1204 = vmatpush.msra.mxu1 %v531_v42  ;;  %v363_v1 = vld [vmem:[%s2498_s2 + $0xe0] sm:$0xff]  ;;  %v676_v27 = vld [vmem:[%s2498_s2 + $0xaa8] sm:$0xff] }
  0xf6   : > { %1226 = vmatpush.msra.mxu2 %v643_v43  ;;  %1245 = vmatpush.msra.mxu3 %v779_v44  ;;  %v491_v2 = vld [vmem:[%s2498_s2 + $0x4e0] sm:$0xff]  ;;  %v812_v28 = vld [vmem:[%s2498_s2 + $0xee8] sm:$0xff] }
  0xf7   : > { %1185 = vmatpush.msra.mxu0 %v395_v45  ;;  %1205 = vmatpush.msra.mxu1 %v523_v47  ;;  %v603_v3 = vld [vmem:[%s2498_s2 + $0x860] sm:$0xff]  ;;  %v428_v29 = vld [vmem:[%s2498_s2 + $0x2e8] sm:$0xff] }
  0xf8   : > { %1227 = vmatpush.msra.mxu2 %v635_v48  ;;  %1246 = vmatpush.msra.mxu3 %v771_v49  ;;  %v739_v4 = vld [vmem:[%s2498_s2 + $0xca0] sm:$0xff]  ;;  %v556_v30 = vld [vmem:[%s2498_s2 + $0x6e8] sm:$0xff] }
  0xf9   : > { %1186 = vmatpush.msra.mxu0 %v387_v51  ;;  %1206 = vmatpush.msra.mxu1 %v515_v52  ;;  %v355_v5 = vld [vmem:[%s2498_s2 + $0xa0] sm:$0xff]  ;;  %v668_v31 = vld [vmem:[%s2498_s2 + $0xa68] sm:$0xff] }
  0xfa   : > { %1228 = vmatpush.msra.mxu2 %v627_v53  ;;  %1247 = vmatpush.msra.mxu3 %v763_v54  ;;  %v483_v6 = vld [vmem:[%s2498_s2 + $0x4a0] sm:$0xff]  ;;  %v804_v32 = vld [vmem:[%s2498_s2 + $0xea8] sm:$0xff] }
  0xfb   : > { %1187 = vmatpush.msra.mxu0 %v379_v57  ;;  %1207 = vmatpush.msra.mxu1 %v507_v58  ;;  %v595_v7 = vld [vmem:[%s2498_s2 + $0x820] sm:$0xff]  ;;  %v420_v33 = vld [vmem:[%s2498_s2 + $0x2a8] sm:$0xff] }
  0xfc   : > { %1229 = vmatpush.msra.mxu2 %v619_v59  ;;  %1248 = vmatpush.msra.mxu3 %v755_v60  ;;  %v731_v8 = vld [vmem:[%s2498_s2 + $0xc60] sm:$0xff]  ;;  %v548_v34 = vld [vmem:[%s2498_s2 + $0x6a8] sm:$0xff] }
  0xfd   : > { %1188 = vmatpush.msra.mxu0 %v371_v61  ;;  %1208 = vmatpush.msra.mxu1 %v499_v62  ;;  %v347_v10 = vld [vmem:[%s2498_s2 + $0x60] sm:$0xff]  ;;  %v660_v35 = vld [vmem:[%s2498_s2 + $0xa28] sm:$0xff] }
  0xfe   : > { %1230 = vmatpush.msra.mxu2 %v611_v63  ;;  %1249 = vmatpush.msra.mxu3 %v747_v0  ;;  %v475_v11 = vld [vmem:[%s2498_s2 + $0x460] sm:$0xff]  ;;  %v796_v36 = vld [vmem:[%s2498_s2 + $0xe68] sm:$0xff] }
  0xff   : > { %1189 = vmatpush.msra.mxu0 %v363_v1  ;;  %1209 = vmatpush.msra.mxu1 %v491_v2  ;;  %v723_v12 = vld [vmem:[%s2498_s2 + $0xc20] sm:$0xff]  ;;  %v412_v37 = vld [vmem:[%s2498_s2 + $0x268] sm:$0xff]  ;;  %v2912_v2 = vld.sshfl [vmem:[#allocation1 + $0x18] sm:$0xff pattern:$0x73625140] }
 0x100   : > { %1231 = vmatpush.msra.mxu2 %v603_v3  ;;  %1250 = vmatpush.msra.mxu3 %v739_v4  ;;  %v339_v15 = vld [vmem:[%s2498_s2 + $0x20] sm:$0xff]  ;;  %v540_v38 = vld [vmem:[%s2498_s2 + $0x668] sm:$0xff] }
 0x101   : > { %1190 = vmatpush.msra.mxu0 %v355_v5  ;;  %1210 = vmatpush.msra.mxu1 %v483_v6  ;;  %v467_v16 = vld [vmem:[%s2498_s2 + $0x420] sm:$0xff]  ;;  %v652_v39 = vld [vmem:[%s2498_s2 + $0x9e8] sm:$0xff]  ;;  %v2918_v6 = vld.sshfl [vmem:[#allocation1] sm:$0xff pattern:$0x73625140] }
 0x102   : > { %1232 = vmatpush.msra.mxu2 %v595_v7  ;;  %1251 = vmatpush.msra.mxu3 %v731_v8  ;;  %v788_v40 = vld [vmem:[%s2498_s2 + $0xe28] sm:$0xff] }
 0x103   : > { %1191 = vmatpush.msra.mxu0 %v347_v10  ;;  %1211 = vmatpush.msra.mxu1 %v475_v11  ;;  %v404_v41 = vld [vmem:[%s2498_s2 + $0x228] sm:$0xff] }
 0x104   : > { %1297 = vmatpush.msrb.mxu2 %v716_v9  ;;  %1252 = vmatpush.msra.mxu3 %v723_v12  ;;  %v532_v42 = vld [vmem:[%s2498_s2 + $0x628] sm:$0xff]  ;;  %v2923_v9 = vld.sshfl [vmem:[#allocation1 + $0x8] sm:$0xff pattern:$0x73625140] }
 0x105   : > { %1192 = vmatpush.msra.mxu0 %v339_v15  ;;  %1212 = vmatpush.msra.mxu1 %v467_v16  ;;  %v644_v43 = vld [vmem:[%s2498_s2 + $0x9a8] sm:$0xff] }
 0x106   : > { %1298 = vmatpush.msrb.mxu2 %v708_v13  ;;  %1317 = vmatpush.msrb.mxu3 %v844_v14  ;;  %v780_v44 = vld [vmem:[%s2498_s2 + $0xde8] sm:$0xff]  ;;  %v717_v13 = vld [vmem:[%s2498_s2 + $0xbf0] sm:$0xff] }
 0x107   : > { %1257 = vmatpush.msrb.mxu0 %v460_v17  ;;  %1277 = vmatpush.msrb.mxu1 %v588_v46  ;;  %v396_v45 = vld [vmem:[%s2498_s2 + $0x1e8] sm:$0xff]  ;;  %v709_v17 = vld [vmem:[%s2498_s2 + $0xbb0] sm:$0xff] }
 0x108   : > { %1299 = vmatpush.msrb.mxu2 %v700_v18  ;;  %1318 = vmatpush.msrb.mxu3 %v836_v19  ;;  %v524_v47 = vld [vmem:[%s2498_s2 + $0x5e8] sm:$0xff]  ;;  %v845_v46 = vld [vmem:[%s2498_s2 + $0xff0] sm:$0xff] }
 0x109   : > { %1258 = vmatpush.msrb.mxu0 %v452_v20  ;;  %1278 = vmatpush.msrb.mxu1 %v580_v50  ;;  %v636_v48 = vld [vmem:[%s2498_s2 + $0x968] sm:$0xff]  ;;  %v461_v20 = vld [vmem:[%s2498_s2 + $0x3f0] sm:$0xff] }
 0x10a   : > { %1300 = vmatpush.msrb.mxu2 %v692_v21  ;;  %1319 = vmatpush.msrb.mxu3 %v828_v22  ;;  %v772_v49 = vld [vmem:[%s2498_s2 + $0xda8] sm:$0xff]  ;;  %v589_v50 = vld [vmem:[%s2498_s2 + $0x7f0] sm:$0xff] }
 0x10b   : > { %1259 = vmatpush.msrb.mxu0 %v444_v23  ;;  %1279 = vmatpush.msrb.mxu1 %v572_v55  ;;  %v388_v51 = vld [vmem:[%s2498_s2 + $0x1a8] sm:$0xff]  ;;  %v701_v21 = vld [vmem:[%s2498_s2 + $0xb70] sm:$0xff] }
 0x10c   : > { %1301 = vmatpush.msrb.mxu2 %v684_v24  ;;  %1320 = vmatpush.msrb.mxu3 %v820_v56  ;;  %v516_v52 = vld [vmem:[%s2498_s2 + $0x5a8] sm:$0xff]  ;;  %v837_v22 = vld [vmem:[%s2498_s2 + $0xfb0] sm:$0xff] }
 0x10d   : > { %1260 = vmatpush.msrb.mxu0 %v436_v25  ;;  %1280 = vmatpush.msrb.mxu1 %v564_v26  ;;  %v628_v53 = vld [vmem:[%s2498_s2 + $0x928] sm:$0xff]  ;;  %v453_v23 = vld [vmem:[%s2498_s2 + $0x3b0] sm:$0xff] }
 0x10e   : > { %1302 = vmatpush.msrb.mxu2 %v676_v27  ;;  %1321 = vmatpush.msrb.mxu3 %v812_v28  ;;  %v764_v54 = vld [vmem:[%s2498_s2 + $0xd68] sm:$0xff]  ;;  %v581_v55 = vld [vmem:[%s2498_s2 + $0x7b0] sm:$0xff] }
 0x10f   : > { %1261 = vmatpush.msrb.mxu0 %v428_v29  ;;  %1281 = vmatpush.msrb.mxu1 %v556_v30  ;;  %v380_v57 = vld [vmem:[%s2498_s2 + $0x168] sm:$0xff]  ;;  %v693_v24 = vld [vmem:[%s2498_s2 + $0xb30] sm:$0xff] }
 0x110   : > { %1303 = vmatpush.msrb.mxu2 %v668_v31  ;;  %1322 = vmatpush.msrb.mxu3 %v804_v32  ;;  %v508_v58 = vld [vmem:[%s2498_s2 + $0x568] sm:$0xff]  ;;  %v829_v56 = vld [vmem:[%s2498_s2 + $0xf70] sm:$0xff] }
 0x111   : > { %1262 = vmatpush.msrb.mxu0 %v420_v33  ;;  %1282 = vmatpush.msrb.mxu1 %v548_v34  ;;  %v620_v59 = vld [vmem:[%s2498_s2 + $0x8e8] sm:$0xff]  ;;  %v445_v25 = vld [vmem:[%s2498_s2 + $0x370] sm:$0xff] }
 0x112   : > { %1304 = vmatpush.msrb.mxu2 %v660_v35  ;;  %1323 = vmatpush.msrb.mxu3 %v796_v36  ;;  %v756_v60 = vld [vmem:[%s2498_s2 + $0xd28] sm:$0xff]  ;;  %v573_v26 = vld [vmem:[%s2498_s2 + $0x770] sm:$0xff] }
 0x113   : > { %1263 = vmatpush.msrb.mxu0 %v412_v37  ;;  %1283 = vmatpush.msrb.mxu1 %v540_v38  ;;  %v2905_v61 = vld.sshfl [vmem:[#allocation1 + $0x10] sm:$0xff pattern:$0x73625140]  ;;  %v685_v27 = vld [vmem:[%s2498_s2 + $0xaf0] sm:$0xff] }
 0x114   : > { %1305 = vmatpush.msrb.mxu2 %v652_v39  ;;  %1324 = vmatpush.msrb.mxu3 %v788_v40  ;;  %v372_v62 = vld [vmem:[%s2498_s2 + $0x128] sm:$0xff]  ;;  %v821_v28 = vld [vmem:[%s2498_s2 + $0xf30] sm:$0xff] }
 0x115   : > { %1264 = vmatpush.msrb.mxu0 %v404_v41  ;;  %1284 = vmatpush.msrb.mxu1 %v532_v42  ;;  %v500_v63 = vld [vmem:[%s2498_s2 + $0x528] sm:$0xff]  ;;  %v437_v29 = vld [vmem:[%s2498_s2 + $0x330] sm:$0xff] }
 0x116   : > { %1306 = vmatpush.msrb.mxu2 %v644_v43  ;;  %1325 = vmatpush.msrb.mxu3 %v780_v44  ;;  %v612_v0 = vld [vmem:[%s2498_s2 + $0x8a8] sm:$0xff]  ;;  %v565_v30 = vld [vmem:[%s2498_s2 + $0x730] sm:$0xff] }
 0x117   : > { %1265 = vmatpush.msrb.mxu0 %v396_v45  ;;  %1285 = vmatpush.msrb.mxu1 %v524_v47  ;;  %v748_v1 = vld [vmem:[%s2498_s2 + $0xce8] sm:$0xff]  ;;  %v677_v31 = vld [vmem:[%s2498_s2 + $0xab0] sm:$0xff] }
 0x118   : > { %1307 = vmatpush.msrb.mxu2 %v636_v48  ;;  %1326 = vmatpush.msrb.mxu3 %v772_v49  ;;  %v364_v3 = vld [vmem:[%s2498_s2 + $0xe8] sm:$0xff]  ;;  %v813_v32 = vld [vmem:[%s2498_s2 + $0xef0] sm:$0xff] }
 0x119   : > { %1266 = vmatpush.msrb.mxu0 %v388_v51  ;;  %1286 = vmatpush.msrb.mxu1 %v516_v52  ;;  %v492_v4 = vld [vmem:[%s2498_s2 + $0x4e8] sm:$0xff]  ;;  %v429_v33 = vld [vmem:[%s2498_s2 + $0x2f0] sm:$0xff] }
 0x11a   : > { %1308 = vmatpush.msrb.mxu2 %v628_v53  ;;  %1327 = vmatpush.msrb.mxu3 %v764_v54  ;;  %v604_v5 = vld [vmem:[%s2498_s2 + $0x868] sm:$0xff]  ;;  %v557_v34 = vld [vmem:[%s2498_s2 + $0x6f0] sm:$0xff] }
 0x11b   : > { %1233 = vmatmul.f32.vlgmr.msra.gmra.mxu2 %v2905_v61  ;;  %1267 = vmatpush.msrb.mxu0 %v380_v57  ;;  %v740_v7 = vld [vmem:[%s2498_s2 + $0xca8] sm:$0xff]  ;;  %v669_v35 = vld [vmem:[%s2498_s2 + $0xa70] sm:$0xff] }
 0x11c   : > { %1287 = vmatpush.msrb.mxu1 %v508_v58  ;;  %1309 = vmatpush.msrb.mxu2 %v620_v59  ;;  %v356_v8 = vld [vmem:[%s2498_s2 + $0xa8] sm:$0xff]  ;;  %v805_v36 = vld [vmem:[%s2498_s2 + $0xeb0] sm:$0xff] }
 0x11d   : > { %1328 = vmatpush.msrb.mxu3 %v756_v60  ;;  %1268 = vmatpush.msrb.mxu0 %v372_v62  ;;  %v484_v10 = vld [vmem:[%s2498_s2 + $0x4a8] sm:$0xff]  ;;  %v421_v37 = vld [vmem:[%s2498_s2 + $0x2b0] sm:$0xff] }
 0x11e   : > { %1253 = vmatmul.f32.vlgmr.msra.gmra.mxu3 %v2912_v2  ;;  %1288 = vmatpush.msrb.mxu1 %v500_v63  ;;  %v596_v11 = vld [vmem:[%s2498_s2 + $0x828] sm:$0xff]  ;;  %v549_v38 = vld [vmem:[%s2498_s2 + $0x6b0] sm:$0xff] }
 0x11f   : > { %1310 = vmatpush.msrb.mxu2 %v612_v0  ;;  %1329 = vmatpush.msrb.mxu3 %v748_v1  ;;  %v732_v12 = vld [vmem:[%s2498_s2 + $0xc68] sm:$0xff]  ;;  %v661_v39 = vld [vmem:[%s2498_s2 + $0xa30] sm:$0xff] }
 0x120   : > { %1193 = vmatmul.f32.vlgmr.msra.gmra.mxu0 %v2918_v6  ;;  %1213 = vmatmul.f32.vlgmr.msra.gmra.mxu1 %v2923_v9  ;;  %v348_v14 = vld [vmem:[%s2498_s2 + $0x68] sm:$0xff]  ;;  %v797_v40 = vld [vmem:[%s2498_s2 + $0xe70] sm:$0xff] }
 0x121   : > { %1269 = vmatpush.msrb.mxu0 %v364_v3  ;;  %1289 = vmatpush.msrb.mxu1 %v492_v4  ;;  %v476_v15 = vld [vmem:[%s2498_s2 + $0x468] sm:$0xff]  ;;  %v413_v41 = vld [vmem:[%s2498_s2 + $0x270] sm:$0xff] }
 0x122   : > { %1311 = vmatpush.msrb.mxu2 %v604_v5  ;;  %1330 = vmatpush.msrb.mxu3 %v740_v7  ;;  %v724_v16 = vld [vmem:[%s2498_s2 + $0xc28] sm:$0xff]  ;;  %v541_v42 = vld [vmem:[%s2498_s2 + $0x670] sm:$0xff] }
 0x123   : > { %1270 = vmatpush.msrb.mxu0 %v356_v8  ;;  %1290 = vmatpush.msrb.mxu1 %v484_v10  ;;  %v340_v18 = vld [vmem:[%s2498_s2 + $0x28] sm:$0xff]  ;;  %v653_v43 = vld [vmem:[%s2498_s2 + $0x9f0] sm:$0xff] }
 0x124   : > { %1312 = vmatpush.msrb.mxu2 %v596_v11  ;;  %1331 = vmatpush.msrb.mxu3 %v732_v12  ;;  %v468_v19 = vld [vmem:[%s2498_s2 + $0x428] sm:$0xff]  ;;  %v789_v44 = vld [vmem:[%s2498_s2 + $0xe30] sm:$0xff] }
 0x125   : > { %1313 = vmatmul.f32.vlgmr.msrb.gmra.mxu2 %v2905_v61  ;;  %1271 = vmatpush.msrb.mxu0 %v348_v14  ;;  %v405_v45 = vld [vmem:[%s2498_s2 + $0x230] sm:$0xff] }
 0x126   : > { %1377 = vmatpush.msra.mxu2 %v717_v13  ;;  %1291 = vmatpush.msrb.mxu1 %v476_v15  ;;  %v533_v47 = vld [vmem:[%s2498_s2 + $0x630] sm:$0xff] }
 0x127   : > { %1332 = vmatpush.msrb.mxu3 %v724_v16  ;;  %1272 = vmatpush.msrb.mxu0 %v340_v18  ;;  %v645_v48 = vld [vmem:[%s2498_s2 + $0x9b0] sm:$0xff] }
 0x128   : > { %1333 = vmatmul.f32.vlgmr.msrb.gmra.mxu3 %v2912_v2  ;;  %1378 = vmatpush.msra.mxu2 %v709_v17  ;;  %v781_v49 = vld [vmem:[%s2498_s2 + $0xdf0] sm:$0xff]  ;;  %v718_v17 = vld [vmem:[%s2498_s2 + $0xbf8] sm:$0xff] }
 0x129   : > { %1397 = vmatpush.msra.mxu3 %v845_v46  ;;  %1292 = vmatpush.msrb.mxu1 %v468_v19  ;;  %v397_v51 = vld [vmem:[%s2498_s2 + $0x1f0] sm:$0xff] }
 0x12a   : > { %1273 = vmatmul.f32.vlgmr.msrb.gmra.mxu0 %v2918_v6  ;;  %1293 = vmatmul.f32.vlgmr.msrb.gmra.mxu1 %v2923_v9  ;;  %v525_v52 = vld [vmem:[%s2498_s2 + $0x5f0] sm:$0xff] }
 0x12b   : > { %1337 = vmatpush.msra.mxu0 %v461_v20  ;;  %1357 = vmatpush.msra.mxu1 %v589_v50  ;;  %v637_v53 = vld [vmem:[%s2498_s2 + $0x970] sm:$0xff]  ;;  %v710_v20 = vld [vmem:[%s2498_s2 + $0xbb8] sm:$0xff]  ;;  %v3002_v50 = vpop.f32.mrf.mxu0 }
 0x12c   : > { %1379 = vmatpush.msra.mxu2 %v701_v21  ;;  %1398 = vmatpush.msra.mxu3 %v837_v22  ;;  %v773_v54 = vld [vmem:[%s2498_s2 + $0xdb0] sm:$0xff]  ;;  %v846_v21 = vld [vmem:[%s2498_s2 + $0xff8] sm:$0xff] }
 0x12d   : > { %1338 = vmatpush.msra.mxu0 %v453_v23  ;;  %1358 = vmatpush.msra.mxu1 %v581_v55  ;;  %v389_v57 = vld [vmem:[%s2498_s2 + $0x1b0] sm:$0xff]  ;;  %v3006_v23 = vpop.f32.mrf.mxu1  ;;  %v3008_v55 = vpop.f32.mrf.mxu2 }
 0x12e   : > { %1380 = vmatpush.msra.mxu2 %v693_v24  ;;  %1399 = vmatpush.msra.mxu3 %v829_v56  ;;  %v517_v58 = vld [vmem:[%s2498_s2 + $0x5b0] sm:$0xff]  ;;  %v462_v56 = vld [vmem:[%s2498_s2 + $0x3f8] sm:$0xff] }
 0x12f   : > { %1339 = vmatpush.msra.mxu0 %v445_v25  ;;  %1359 = vmatpush.msra.mxu1 %v573_v26  ;;  %v629_v59 = vld [vmem:[%s2498_s2 + $0x930] sm:$0xff]  ;;  %v590_v25 = vld [vmem:[%s2498_s2 + $0x7f8] sm:$0xff] }
 0x130   : > { %1381 = vmatpush.msra.mxu2 %v685_v27  ;;  %1400 = vmatpush.msra.mxu3 %v821_v28  ;;  %v765_v60 = vld [vmem:[%s2498_s2 + $0xd70] sm:$0xff]  ;;  %v702_v26 = vld [vmem:[%s2498_s2 + $0xb78] sm:$0xff] }
 0x131   : > { %1340 = vmatpush.msra.mxu0 %v437_v29  ;;  %1360 = vmatpush.msra.mxu1 %v565_v30  ;;  %v381_v62 = vld [vmem:[%s2498_s2 + $0x170] sm:$0xff]  ;;  %v838_v27 = vld [vmem:[%s2498_s2 + $0xfb8] sm:$0xff]  ;;  %v3016_v29 = vpop.f32.mrf.mxu3 }
 0x132   : > { %1382 = vmatpush.msra.mxu2 %v677_v31  ;;  %1401 = vmatpush.msra.mxu3 %v813_v32  ;;  %v509_v63 = vld [vmem:[%s2498_s2 + $0x570] sm:$0xff]  ;;  %v454_v28 = vld [vmem:[%s2498_s2 + $0x3b8] sm:$0xff] }
 0x133   : > { %1341 = vmatpush.msra.mxu0 %v429_v33  ;;  %1361 = vmatpush.msra.mxu1 %v557_v34  ;;  %v621_v0 = vld [vmem:[%s2498_s2 + $0x8f0] sm:$0xff]  ;;  %v582_v30 = vld [vmem:[%s2498_s2 + $0x7b8] sm:$0xff] }
 0x134   : > { %1383 = vmatpush.msra.mxu2 %v669_v35  ;;  %1402 = vmatpush.msra.mxu3 %v805_v36  ;;  %v757_v1 = vld [vmem:[%s2498_s2 + $0xd30] sm:$0xff]  ;;  %v694_v31 = vld [vmem:[%s2498_s2 + $0xb38] sm:$0xff] }
 0x135   : > { %1342 = vmatpush.msra.mxu0 %v421_v37  ;;  %1362 = vmatpush.msra.mxu1 %v549_v38  ;;  %v373_v3 = vld [vmem:[%s2498_s2 + $0x130] sm:$0xff]  ;;  %v830_v32 = vld [vmem:[%s2498_s2 + $0xf78] sm:$0xff] }
 0x136   : > { %1384 = vmatpush.msra.mxu2 %v661_v39  ;;  %1403 = vmatpush.msra.mxu3 %v797_v40  ;;  %v501_v4 = vld [vmem:[%s2498_s2 + $0x530] sm:$0xff]  ;;  %v446_v33 = vld [vmem:[%s2498_s2 + $0x378] sm:$0xff] }
 0x137   : > { %1343 = vmatpush.msra.mxu0 %v413_v41  ;;  %1363 = vmatpush.msra.mxu1 %v541_v42  ;;  %v613_v5 = vld [vmem:[%s2498_s2 + $0x8b0] sm:$0xff]  ;;  %v574_v34 = vld [vmem:[%s2498_s2 + $0x778] sm:$0xff]  ;;  %v954_v42 = vpop.f32.mrf.mxu0 }
 0x138   : > { %1385 = vmatpush.msra.mxu2 %v653_v43  ;;  %1404 = vmatpush.msra.mxu3 %v789_v44  ;;  %v749_v7 = vld [vmem:[%s2498_s2 + $0xcf0] sm:$0xff]  ;;  %v686_v35 = vld [vmem:[%s2498_s2 + $0xaf8] sm:$0xff] }
 0x139   : > { %1344 = vmatpush.msra.mxu0 %v405_v45  ;;  %1364 = vmatpush.msra.mxu1 %v533_v47  ;;  %v365_v8 = vld [vmem:[%s2498_s2 + $0xf0] sm:$0xff]  ;;  %v822_v36 = vld [vmem:[%s2498_s2 + $0xf38] sm:$0xff]  ;;  %v974_v45 = vpop.f32.mrf.mxu1  ;;  %v3032_v47 = vpop.f32.mrf.mxu2 }
 0x13a   : > { %1386 = vmatpush.msra.mxu2 %v645_v48  ;;  %1405 = vmatpush.msra.mxu3 %v781_v49  ;;  %v493_v10 = vld [vmem:[%s2498_s2 + $0x4f0] sm:$0xff]  ;;  %v438_v37 = vld [vmem:[%s2498_s2 + $0x338] sm:$0xff] }
 0x13b   : > { %1345 = vmatpush.msra.mxu0 %v397_v51  ;;  %1365 = vmatpush.msra.mxu1 %v525_v52  ;;  %v605_v11 = vld [vmem:[%s2498_s2 + $0x870] sm:$0xff]  ;;  %v566_v38 = vld [vmem:[%s2498_s2 + $0x738] sm:$0xff] }
 0x13c   : > { %1387 = vmatpush.msra.mxu2 %v637_v53  ;;  %1406 = vmatpush.msra.mxu3 %v773_v54  ;;  %v741_v12 = vld [vmem:[%s2498_s2 + $0xcb0] sm:$0xff]  ;;  %v678_v39 = vld [vmem:[%s2498_s2 + $0xab8] sm:$0xff] }
 0x13d   : > { %1346 = vmatpush.msra.mxu0 %v389_v57  ;;  %1366 = vmatpush.msra.mxu1 %v517_v58  ;;  %v357_v13 = vld [vmem:[%s2498_s2 + $0xb0] sm:$0xff]  ;;  %v814_v40 = vld [vmem:[%s2498_s2 + $0xef8] sm:$0xff]  ;;  %v3040_v57 = vpop.f32.mrf.mxu3 }
 0x13e   : > { %1388 = vmatpush.msra.mxu2 %v629_v59  ;;  %1407 = vmatpush.msra.mxu3 %v765_v60  ;;  %v485_v14 = vld [vmem:[%s2498_s2 + $0x4b0] sm:$0xff]  ;;  %v430_v41 = vld [vmem:[%s2498_s2 + $0x2f8] sm:$0xff] }
 0x13f   : > { %1347 = vmatpush.msra.mxu0 %v381_v62  ;;  %1367 = vmatpush.msra.mxu1 %v509_v63  ;;  %v597_v15 = vld [vmem:[%s2498_s2 + $0x830] sm:$0xff]  ;;  %v558_v43 = vld [vmem:[%s2498_s2 + $0x6f8] sm:$0xff] }
 0x140   : > { %1389 = vmatpush.msra.mxu2 %v621_v0  ;;  %1408 = vmatpush.msra.mxu3 %v757_v1  ;;  %v733_v16 = vld [vmem:[%s2498_s2 + $0xc70] sm:$0xff]  ;;  %v670_v44 = vld [vmem:[%s2498_s2 + $0xa78] sm:$0xff] }
 0x141   : > { %1348 = vmatpush.msra.mxu0 %v373_v3  ;;  %1368 = vmatpush.msra.mxu1 %v501_v4  ;;  %v349_v46 = vld [vmem:[%s2498_s2 + $0x70] sm:$0xff]  ;;  %v806_v48 = vld [vmem:[%s2498_s2 + $0xeb8] sm:$0xff] }
 0x142   : > { %1390 = vmatpush.msra.mxu2 %v613_v5  ;;  %1409 = vmatpush.msra.mxu3 %v749_v7  ;;  %v477_v18 = vld [vmem:[%s2498_s2 + $0x470] sm:$0xff]  ;;  %v422_v49 = vld [vmem:[%s2498_s2 + $0x2b8] sm:$0xff] }
 0x143   : > { %1349 = vmatpush.msra.mxu0 %v365_v8  ;;  %1369 = vmatpush.msra.mxu1 %v493_v10  ;;  %v725_v19 = vld [vmem:[%s2498_s2 + $0xc30] sm:$0xff]  ;;  %v550_v51 = vld [vmem:[%s2498_s2 + $0x6b8] sm:$0xff] }
 0x144   : > { %1391 = vmatpush.msra.mxu2 %v605_v11  ;;  %1410 = vmatpush.msra.mxu3 %v741_v12  ;;  %v341_v22 = vld [vmem:[%s2498_s2 + $0x30] sm:$0xff]  ;;  %v662_v52 = vld [vmem:[%s2498_s2 + $0xa38] sm:$0xff] }
 0x145   : > { %1350 = vmatpush.msra.mxu0 %v357_v13  ;;  %1370 = vmatpush.msra.mxu1 %v485_v14  ;;  %v469_v24 = vld [vmem:[%s2498_s2 + $0x430] sm:$0xff]  ;;  %v798_v53 = vld [vmem:[%s2498_s2 + $0xe78] sm:$0xff] }
 0x146   : > { %1392 = vmatpush.msra.mxu2 %v597_v15  ;;  %1411 = vmatpush.msra.mxu3 %v733_v16  ;;  %v414_v54 = vld [vmem:[%s2498_s2 + $0x278] sm:$0xff]  ;;  %v975_v16 = vadd.f32 %v974_v45, %v954_v42 }
 0x147   : > { %1351 = vmatpush.msra.mxu0 %v349_v46  ;;  %1371 = vmatpush.msra.mxu1 %v477_v18  ;;  %v542_v58 = vld [vmem:[%s2498_s2 + $0x678] sm:$0xff] }
 0x148   : > { %1457 = vmatpush.msrb.mxu2 %v718_v17  ;;  %1412 = vmatpush.msra.mxu3 %v725_v19  ;;  %v654_v59 = vld [vmem:[%s2498_s2 + $0x9f8] sm:$0xff] }
 0x149   : > { %1352 = vmatpush.msra.mxu0 %v341_v22  ;;  %1372 = vmatpush.msra.mxu1 %v469_v24  ;;  %v790_v60 = vld [vmem:[%s2498_s2 + $0xe38] sm:$0xff] }
 0x14a   : > { %1458 = vmatpush.msrb.mxu2 %v710_v20  ;;  %1477 = vmatpush.msrb.mxu3 %v846_v21  ;;  %v406_v62 = vld [vmem:[%s2498_s2 + $0x238] sm:$0xff] }
 0x14b   : > { %1417 = vmatpush.msrb.mxu0 %v462_v56  ;;  %1437 = vmatpush.msrb.mxu1 %v590_v25  ;;  %v534_v63 = vld [vmem:[%s2498_s2 + $0x638] sm:$0xff]  ;;  %v995_v25 = vadd.f32 %v3032_v47, %v975_v16 }
 0x14c   : > { %1459 = vmatpush.msrb.mxu2 %v702_v26  ;;  %1478 = vmatpush.msrb.mxu3 %v838_v27  ;;  %v646_v0 = vld [vmem:[%s2498_s2 + $0x9b8] sm:$0xff] }
 0x14d   : > { %1418 = vmatpush.msrb.mxu0 %v454_v28  ;;  %1438 = vmatpush.msrb.mxu1 %v582_v30  ;;  %v782_v1 = vld [vmem:[%s2498_s2 + $0xdf8] sm:$0xff]  ;;  %v895_v30 = vadd.f32 %v3006_v23, %v3002_v50 }
 0x14e   : > { %1460 = vmatpush.msrb.mxu2 %v694_v31  ;;  %1479 = vmatpush.msrb.mxu3 %v830_v32  ;;  %v398_v3 = vld [vmem:[%s2498_s2 + $0x1f8] sm:$0xff] }
 0x14f   : > { %1419 = vmatpush.msrb.mxu0 %v446_v33  ;;  %1439 = vmatpush.msrb.mxu1 %v574_v34  ;;  %v526_v4 = vld [vmem:[%s2498_s2 + $0x5f8] sm:$0xff]  ;;  %v915_v42 = vadd.f32 %v3008_v55, %v895_v30 }
 0x150   : > { %1461 = vmatpush.msrb.mxu2 %v686_v35  ;;  %1480 = vmatpush.msrb.mxu3 %v822_v36  ;;  %v638_v5 = vld [vmem:[%s2498_s2 + $0x978] sm:$0xff] }
 0x151   : > { %1420 = vmatpush.msrb.mxu0 %v438_v37  ;;  %1440 = vmatpush.msrb.mxu1 %v566_v38  ;;  %v774_v8 = vld [vmem:[%s2498_s2 + $0xdb8] sm:$0xff]  ;;  %v1015_v38 = vadd.f32 %v3040_v57, %v995_v25 }
 0x152   : > { %1462 = vmatpush.msrb.mxu2 %v678_v39  ;;  %1481 = vmatpush.msrb.mxu3 %v814_v40  ;;  %v390_v10 = vld [vmem:[%s2498_s2 + $0x1b8] sm:$0xff] }
 0x153   : > { %1421 = vmatpush.msrb.mxu0 %v430_v41  ;;  %1441 = vmatpush.msrb.mxu1 %v558_v43  ;;  %v518_v13 = vld [vmem:[%s2498_s2 + $0x5b8] sm:$0xff] }
 0x154   : > { %1463 = vmatpush.msrb.mxu2 %v670_v44  ;;  %1482 = vmatpush.msrb.mxu3 %v806_v48  ;;  %v630_v14 = vld [vmem:[%s2498_s2 + $0x938] sm:$0xff] }
 0x155   : > { %1422 = vmatpush.msrb.mxu0 %v422_v49  ;;  %1442 = vmatpush.msrb.mxu1 %v550_v51  ;;  %v766_v15 = vld [vmem:[%s2498_s2 + $0xd78] sm:$0xff]  ;;  %v1505_v49 = vrot.slane %v1015_v38, 6 }
 0x156   : > { %1464 = vmatpush.msrb.mxu2 %v662_v52  ;;  %1483 = vmatpush.msrb.mxu3 %v798_v53  ;;  %v382_v17 = vld [vmem:[%s2498_s2 + $0x178] sm:$0xff] }
 0x157   : > { %1423 = vmatpush.msrb.mxu0 %v414_v54  ;;  %1443 = vmatpush.msrb.mxu1 %v542_v58  ;;  %v510_v46 = vld [vmem:[%s2498_s2 + $0x578] sm:$0xff]  ;;  %v935_v54 = vadd.f32 %v3016_v29, %v915_v42  ;;  %v332_v58 = vld [vmem:[#allocation2] sm:$0xff] }
 0x158   : > { %1465 = vmatpush.msrb.mxu2 %v654_v59  ;;  %1484 = vmatpush.msrb.mxu3 %v790_v60  ;;  %v622_v20 = vld [vmem:[%s2498_s2 + $0x8f8] sm:$0xff] }
 0x159   : > { %1424 = vmatpush.msrb.mxu0 %v406_v62  ;;  %v1034_v7 = vpop.f32.mrf.mxu0  ;;  %1444 = vmatpush.msrb.mxu1 %v534_v63  ;;  %v1054_v11 = vpop.f32.mrf.mxu1  ;;  %v758_v21 = vld [vmem:[%s2498_s2 + $0xd38] sm:$0xff]  ;;  %v1512_v59 = vsel %vm1511_vm0, %v935_v54, %v1505_v49 }
 0x15a   : > { %1466 = vmatpush.msrb.mxu2 %v646_v0  ;;  %v1074_v12 = vpop.f32.mrf.mxu2  ;;  %1485 = vmatpush.msrb.mxu3 %v782_v1  ;;  %v1055_v18 = vadd.f32 %v1054_v11, %v1034_v7  ;;  %v374_v22 = vld [vmem:[%s2498_s2 + $0x138] sm:$0xff] }
 0x15b   : > { %1425 = vmatpush.msrb.mxu0 %v398_v3  ;;  %1445 = vmatpush.msrb.mxu1 %v526_v4  ;;  %v502_v24 = vld [vmem:[%s2498_s2 + $0x538] sm:$0xff] }
 0x15c   : > { %1467 = vmatpush.msrb.mxu2 %v638_v5  ;;  %1486 = vmatpush.msrb.mxu3 %v774_v8  ;;  %v614_v56 = vld [vmem:[%s2498_s2 + $0x8b8] sm:$0xff]  ;;  %v1075_v27 = vadd.f32 %v1074_v12, %v1055_v18 }
 0x15d   : > { %1426 = vmatpush.msrb.mxu0 %v390_v10  ;;  %v1094_v19 = vpop.f32.mrf.mxu3  ;;  %1446 = vmatpush.msrb.mxu1 %v518_v13  ;;  %v750_v26 = vld [vmem:[%s2498_s2 + $0xcf8] sm:$0xff] }
 0x15e   : > { %1468 = vmatpush.msrb.mxu2 %v630_v14  ;;  %1487 = vmatpush.msrb.mxu3 %v766_v15  ;;  %v366_v28 = vld [vmem:[%s2498_s2 + $0xf8] sm:$0xff]  ;;  %v1095_v39 = vadd.f32 %v1094_v19, %v1075_v27 }
 0x15f   : > { %1393 = vmatmul.f32.vlgmr.msra.gmra.mxu2 %v2905_v61  ;;  %1427 = vmatpush.msrb.mxu0 %v382_v17  ;;  %v494_v31 = vld [vmem:[%s2498_s2 + $0x4f8] sm:$0xff] }
 0x160   : > { %1447 = vmatpush.msrb.mxu1 %v510_v46  ;;  %1469 = vmatpush.msrb.mxu2 %v622_v20  ;;  %v606_v32 = vld [vmem:[%s2498_s2 + $0x878] sm:$0xff]  ;;  %v1506_v51 = vrot.slane %v1095_v39, 4 }
 0x161   : > { %1488 = vmatpush.msrb.mxu3 %v758_v21  ;;  %1428 = vmatpush.msrb.mxu0 %v374_v22  ;;  %v742_v34 = vld [vmem:[%s2498_s2 + $0xcb8] sm:$0xff] }
 0x162   : > { %1413 = vmatmul.f32.vlgmr.msra.gmra.mxu3 %v2912_v2  ;;  %1448 = vmatpush.msrb.mxu1 %v502_v24  ;;  %v358_v35 = vld [vmem:[%s2498_s2 + $0xb8] sm:$0xff] }
 0x163   : > { %1470 = vmatpush.msrb.mxu2 %v614_v56  ;;  %v1114_v33 = vpop.f32.mrf.mxu0  ;;  %1489 = vmatpush.msrb.mxu3 %v750_v26  ;;  %v1134_v36 = vpop.f32.mrf.mxu1  ;;  %v486_v50 = vld [vmem:[%s2498_s2 + $0x4b8] sm:$0xff] }
 0x164   : > { %1353 = vmatmul.f32.vlgmr.msra.gmra.mxu0 %v2918_v6  ;;  %v1154_v37 = vpop.f32.mrf.mxu2  ;;  %1373 = vmatmul.f32.vlgmr.msra.gmra.mxu1 %v2923_v9  ;;  %v598_v23 = vld [vmem:[%s2498_s2 + $0x838] sm:$0xff]  ;;  %v1135_v40 = vadd.f32 %v1134_v36, %v1114_v33 }
 0x165   : > { %1429 = vmatpush.msrb.mxu0 %v366_v28  ;;  %1449 = vmatpush.msrb.mxu1 %v494_v31  ;;  %v734_v41 = vld [vmem:[%s2498_s2 + $0xc78] sm:$0xff]  ;;  %v333_v28 = vld [vmem:[#allocation2 + $0x8] sm:$0xff] }
 0x166   : > { %1471 = vmatpush.msrb.mxu2 %v606_v32  ;;  %1490 = vmatpush.msrb.mxu3 %v742_v34  ;;  %v350_v43 = vld [vmem:[%s2498_s2 + $0x78] sm:$0xff]  ;;  %v1155_v45 = vadd.f32 %v1154_v37, %v1135_v40 }
 0x167   : > { %1430 = vmatpush.msrb.mxu0 %v358_v35  ;;  %v478_v44 = vld [vmem:[%s2498_s2 + $0x478] sm:$0xff]  ;;  %v1174_v47 = vpop.f32.mrf.mxu3  ;;  %1450 = vmatpush.msrb.mxu1 %v486_v50 }
 0x168   : > { %1472 = vmatpush.msrb.mxu2 %v598_v23  ;;  %v726_v48 = vld [vmem:[%s2498_s2 + $0xc38] sm:$0xff]  ;;  %1491 = vmatpush.msrb.mxu3 %v734_v41  ;;  %v1175_v53 = vadd.f32 %v1174_v47, %v1155_v45 }
 0x169   : > { %1473 = vmatmul.f32.vlgmr.msrb.gmra.mxu2 %v2905_v61  ;;  %v342_v52 = vld [vmem:[%s2498_s2 + $0x38] sm:$0xff]  ;;  %1431 = vmatpush.msrb.mxu0 %v350_v43 }
 0x16a   : > { %1451 = vmatpush.msrb.mxu1 %v478_v44  ;;  %v470_v55 = vld [vmem:[%s2498_s2 + $0x438] sm:$0xff]  ;;  %1492 = vmatpush.msrb.mxu3 %v726_v48  ;;  %v1507_v57 = vrot.slane %v1175_v53, 2 }
 0x16b   : > { %1493 = vmatmul.f32.vlgmr.msrb.gmra.mxu3 %v2912_v2  ;;  %1432 = vmatpush.msrb.mxu0 %v342_v52 }
 0x16c   : > { %1452 = vmatpush.msrb.mxu1 %v470_v55  ;;  %1433 = vmatmul.f32.vlgmr.msrb.gmra.mxu0 %v2918_v6  ;;  %v1514_v61 = vsel %vm1513_vm1, %v1506_v51, %v1507_v57 }
 0x16d   : > { %1453 = vmatmul.f32.vlgmr.msrb.gmra.mxu1 %v2923_v9  ;;  %v1516_v60 = vsel %vm1515_vm2, %v1512_v59, %v1514_v61 }
 0x16e   : > { %v1522_v62 = vadd.f32 %v1516_v60, %v332_v58 }
 0x170   : > { %1524 = vst [vmem:[#allocation2] sm:$0xff] %v1522_v62 }
 0x19d   : > { %v1194_v29 = vpop.f32.mrf.mxu0  ;;  %v1214_v63 = vpop.f32.mrf.mxu1 }
 0x19e   : > { %v1234_v0 = vpop.f32.mrf.mxu2  ;;  %v1215_v9 = vadd.f32 %v1214_v63, %v1194_v29 }
 0x1a0   : > { %v1235_v19 = vadd.f32 %v1234_v0, %v1215_v9 }
 0x1a1   : > { %v1254_v1 = vpop.f32.mrf.mxu3 }
 0x1a2   : > { %v1255_v25 = vadd.f32 %v1254_v1, %v1235_v19 }
 0x1a7   : > { %v1274_v2 = vpop.f32.mrf.mxu0  ;;  %v1294_v3 = vpop.f32.mrf.mxu1 }
 0x1a8   : > { %v1314_v4 = vpop.f32.mrf.mxu2  ;;  %v1295_v6 = vadd.f32 %v1294_v3, %v1274_v2 }
 0x1aa   : > { %v1315_v13 = vadd.f32 %v1314_v4, %v1295_v6 }
 0x1ab   : > { %v1334_v5 = vpop.f32.mrf.mxu3 }
 0x1ac   : > { %v1335_v17 = vadd.f32 %v1334_v5, %v1315_v13 }
 0x1ae   : > { %v1508_v24 = vrot.slane %v1335_v17, 6 }
 0x1b0   : > { %v1517_v30 = vsel %vm1511_vm0, %v1255_v25, %v1508_v24 }
 0x1e1   : > { %v1354_v7 = vpop.f32.mrf.mxu0  ;;  %v1374_v8 = vpop.f32.mrf.mxu1 }
 0x1e2   : > { %v1394_v10 = vpop.f32.mrf.mxu2  ;;  %v1375_v12 = vadd.f32 %v1374_v8, %v1354_v7 }
 0x1e4   : > { %v1395_v14 = vadd.f32 %v1394_v10, %v1375_v12 }
 0x1e5   : > { %v1414_v11 = vpop.f32.mrf.mxu3 }
 0x1e6   : > { %v1415_v20 = vadd.f32 %v1414_v11, %v1395_v14 }
 0x1e8   : > { %v1509_v26 = vrot.slane %v1415_v20, 4 }
 0x1e9   : > { %v1434_v15 = vpop.f32.mrf.mxu0 }
 0x1ea   : > { %v1454_v16 = vpop.f32.mrf.mxu1 }
 0x1eb   : > { %v1455_v46 = vadd.f32 %v1454_v16, %v1434_v15 }
 0x1ec   : > { %v1474_v18 = vpop.f32.mrf.mxu2 }
 0x1ed   : > { %v1475_v21 = vadd.f32 %v1474_v18, %v1455_v46 }
 0x1ee   : > { %v1494_v22 = vpop.f32.mrf.mxu3 }
 0x1ef   : > { %v1495_v56 = vadd.f32 %v1494_v22, %v1475_v21 }
 0x1f1   : > { %v1510_v27 = vrot.slane %v1495_v56, 2 }
 0x1f3   : > { %v1518_v31 = vsel %vm1513_vm1, %v1509_v26, %v1510_v27  ;;  %1529 = sbr.rel (%p2034_p1) target bundleno = 971 (0x3cb), region = 64 }
 0x1f4   : > { %v1519_v32 = vsel %vm1515_vm2, %v1517_v30, %v1518_v31 }
 0x1f5   : > { %v1523_v33 = vadd.f32 %v1519_v32, %v333_v28 }
 0x1f7   : > { %1525 = vst [vmem:[#allocation2 + $0x8] sm:$0xff] %v1523_v33 }
 0x1f8   : > { %v1607_v34 = vld [vmem:[%s3517_s3 + $0x178] sm:$0xff]  ;;  %v1606_v36 = vld [vmem:[%s3517_s3 + $0x170] sm:$0xff]  ;;  %v1605_v23 = vld [vmem:[%s3517_s3 + $0x168] sm:$0xff]  ;;  %vm1873_vm3 = vcmask 58368  }
 0x1f9   : > { %v1575_v35 = vld [vmem:[%s3517_s3 + $0x78] sm:$0xff]  ;;  %1753 = vmatpush.msra.mxu2 %v1607_v34  ;;  %v1574_v38 = vld [vmem:[%s3517_s3 + $0x70] sm:$0xff]  ;;  %v1573_v40 = vld [vmem:[%s3517_s3 + $0x68] sm:$0xff] }
 0x1fa   : > { %1713 = vmatpush.msra.mxu0 %v1575_v35  ;;  %v1623_v37 = vld [vmem:[%s3517_s3 + $0x1f8] sm:$0xff]  ;;  %v1622_v39 = vld [vmem:[%s3517_s3 + $0x1f0] sm:$0xff]  ;;  %v1621_v42 = vld [vmem:[%s3517_s3 + $0x1e8] sm:$0xff] }
 0x1fb   : > { %v1591_v50 = vld [vmem:[%s3517_s3 + $0xf8] sm:$0xff]  ;;  %1773 = vmatpush.msra.mxu3 %v1623_v37  ;;  %1754 = vmatpush.msra.mxu2 %v1606_v36  ;;  %v1590_v41 = vld [vmem:[%s3517_s3 + $0xf0] sm:$0xff]  ;;  %v1604_v43 = vld [vmem:[%s3517_s3 + $0x160] sm:$0xff] }
 0x1fc   : > { %1733 = vmatpush.msra.mxu1 %v1591_v50  ;;  %1714 = vmatpush.msra.mxu0 %v1574_v38  ;;  %v1572_v44 = vld [vmem:[%s3517_s3 + $0x60] sm:$0xff]  ;;  %v1589_v45 = vld [vmem:[%s3517_s3 + $0xe8] sm:$0xff]  ;;  %v1603_v49 = vld [vmem:[%s3517_s3 + $0x158] sm:$0xff] }
 0x1fd   : > { %1774 = vmatpush.msra.mxu3 %v1622_v39  ;;  %1755 = vmatpush.msra.mxu2 %v1605_v23  ;;  %v1620_v47 = vld [vmem:[%s3517_s3 + $0x1e0] sm:$0xff]  ;;  %v1571_v51 = vld [vmem:[%s3517_s3 + $0x58] sm:$0xff]  ;;  %v1602_v55 = vld [vmem:[%s3517_s3 + $0x150] sm:$0xff] }
 0x1fe   : > { %1734 = vmatpush.msra.mxu1 %v1590_v41  ;;  %1715 = vmatpush.msra.mxu0 %v1573_v40  ;;  %v1588_v48 = vld [vmem:[%s3517_s3 + $0xe0] sm:$0xff]  ;;  %v1619_v52 = vld [vmem:[%s3517_s3 + $0x1d8] sm:$0xff]  ;;  %v1570_v54 = vld [vmem:[%s3517_s3 + $0x50] sm:$0xff] }
 0x1ff   : > { %1775 = vmatpush.msra.mxu3 %v1621_v42  ;;  %1756 = vmatpush.msra.mxu2 %v1604_v43  ;;  %v1587_v53 = vld [vmem:[%s3517_s3 + $0xd8] sm:$0xff]  ;;  %v1618_v57 = vld [vmem:[%s3517_s3 + $0x1d0] sm:$0xff]  ;;  %v1601_v59 = vld [vmem:[%s3517_s3 + $0x148] sm:$0xff] }
 0x200   : > { %1735 = vmatpush.msra.mxu1 %v1589_v45  ;;  %1716 = vmatpush.msra.mxu0 %v1572_v44  ;;  %v1586_v58 = vld [vmem:[%s3517_s3 + $0xd0] sm:$0xff]  ;;  %v1569_v61 = vld [vmem:[%s3517_s3 + $0x48] sm:$0xff]  ;;  %v1600_v29 = vld [vmem:[%s3517_s3 + $0x140] sm:$0xff] }
 0x201   : > { %1776 = vmatpush.msra.mxu3 %v1620_v47  ;;  %1757 = vmatpush.msra.mxu2 %v1603_v49  ;;  %v1617_v60 = vld [vmem:[%s3517_s3 + $0x1c8] sm:$0xff]  ;;  %v1568_v63 = vld [vmem:[%s3517_s3 + $0x40] sm:$0xff]  ;;  %v1599_v2 = vld [vmem:[%s3517_s3 + $0x138] sm:$0xff] }
 0x202   : > { %1736 = vmatpush.msra.mxu1 %v1588_v48  ;;  %1717 = vmatpush.msra.mxu0 %v1571_v51  ;;  %v1585_v62 = vld [vmem:[%s3517_s3 + $0xc8] sm:$0xff]  ;;  %v1616_v0 = vld [vmem:[%s3517_s3 + $0x1c0] sm:$0xff]  ;;  %v1567_v3 = vld [vmem:[%s3517_s3 + $0x38] sm:$0xff] }
 0x203   : > { %1777 = vmatpush.msra.mxu3 %v1619_v52  ;;  %1758 = vmatpush.msra.mxu2 %v1602_v55  ;;  %v1584_v1 = vld [vmem:[%s3517_s3 + $0xc0] sm:$0xff]  ;;  %v1615_v4 = vld [vmem:[%s3517_s3 + $0x1b8] sm:$0xff]  ;;  %v1598_v7 = vld [vmem:[%s3517_s3 + $0x130] sm:$0xff] }
 0x204   : > { %1737 = vmatpush.msra.mxu1 %v1587_v53  ;;  %1718 = vmatpush.msra.mxu0 %v1570_v54  ;;  %v1583_v5 = vld [vmem:[%s3517_s3 + $0xb8] sm:$0xff]  ;;  %v1566_v8 = vld [vmem:[%s3517_s3 + $0x30] sm:$0xff]  ;;  %v1597_v11 = vld [vmem:[%s3517_s3 + $0x128] sm:$0xff] }
 0x205   : > { %1778 = vmatpush.msra.mxu3 %v1618_v57  ;;  %1759 = vmatpush.msra.mxu2 %v1601_v59  ;;  %v1614_v10 = vld [vmem:[%s3517_s3 + $0x1b0] sm:$0xff]  ;;  %v1565_v12 = vld [vmem:[%s3517_s3 + $0x28] sm:$0xff]  ;;  %v1596_v14 = vld [vmem:[%s3517_s3 + $0x120] sm:$0xff] }
 0x206   : > { %1738 = vmatpush.msra.mxu1 %v1586_v58  ;;  %1719 = vmatpush.msra.mxu0 %v1569_v61  ;;  %v1582_v6 = vld [vmem:[%s3517_s3 + $0xb0] sm:$0xff]  ;;  %v1613_v13 = vld [vmem:[%s3517_s3 + $0x1a8] sm:$0xff]  ;;  %v1564_v15 = vld [vmem:[%s3517_s3 + $0x20] sm:$0xff] }
 0x207   : > { %1779 = vmatpush.msra.mxu3 %v1617_v60  ;;  %1760 = vmatpush.msra.mxu2 %v1600_v29  ;;  %v1581_v9 = vld [vmem:[%s3517_s3 + $0xa8] sm:$0xff]  ;;  %v1612_v16 = vld [vmem:[%s3517_s3 + $0x1a0] sm:$0xff]  ;;  %v1595_v46 = vld [vmem:[%s3517_s3 + $0x118] sm:$0xff] }
 0x208   : > { %1739 = vmatpush.msra.mxu1 %v1585_v62  ;;  %1720 = vmatpush.msra.mxu0 %v1568_v63  ;;  %v1580_v17 = vld [vmem:[%s3517_s3 + $0xa0] sm:$0xff]  ;;  %v1563_v18 = vld [vmem:[%s3517_s3 + $0x18] sm:$0xff]  ;;  %v1594_v21 = vld [vmem:[%s3517_s3 + $0x110] sm:$0xff] }
 0x209   : > { %1780 = vmatpush.msra.mxu3 %v1616_v0  ;;  %1761 = vmatpush.msra.mxu2 %v1599_v2  ;;  %v1611_v19 = vld [vmem:[%s3517_s3 + $0x198] sm:$0xff]  ;;  %v1562_v22 = vld [vmem:[%s3517_s3 + $0x10] sm:$0xff]  ;;  %v1593_v25 = vld [vmem:[%s3517_s3 + $0x108] sm:$0xff] }
 0x20a   : > { %1740 = vmatpush.msra.mxu1 %v1584_v1  ;;  %1721 = vmatpush.msra.mxu0 %v1567_v3  ;;  %v1579_v20 = vld [vmem:[%s3517_s3 + $0x98] sm:$0xff]  ;;  %v1610_v24 = vld [vmem:[%s3517_s3 + $0x190] sm:$0xff]  ;;  %v1561_v26 = vld [vmem:[%s3517_s3 + $0x8] sm:$0xff] }
 0x20b   : > { %1781 = vmatpush.msra.mxu3 %v1615_v4  ;;  %1762 = vmatpush.msra.mxu2 %v1598_v7  ;;  %v1578_v56 = vld [vmem:[%s3517_s3 + $0x90] sm:$0xff]  ;;  %v1609_v27 = vld [vmem:[%s3517_s3 + $0x188] sm:$0xff]  ;;  %v1592_v30 = vld [vmem:[%s3517_s3 + $0x100] sm:$0xff] }
 0x20c   : > { %1741 = vmatpush.msra.mxu1 %v1583_v5  ;;  %1722 = vmatpush.msra.mxu0 %v1566_v8  ;;  %v1577_v28 = vld [vmem:[%s3517_s3 + $0x88] sm:$0xff]  ;;  %v1560_v31 = vld [vmem:[%s3517_s3] sm:$0xff]  ;;  %v1671_v32 = vld [vmem:[%s3517_s3 + $0x378] sm:$0xff] }
 0x20d   : > { %1782 = vmatpush.msra.mxu3 %v1614_v10  ;;  %1763 = vmatpush.msra.mxu2 %v1597_v11  ;;  %v1608_v33 = vld [vmem:[%s3517_s3 + $0x180] sm:$0xff]  ;;  %v1639_v34 = vld [vmem:[%s3517_s3 + $0x278] sm:$0xff]  ;;  %v1670_v36 = vld [vmem:[%s3517_s3 + $0x370] sm:$0xff] }
 0x20e   : > { %1742 = vmatpush.msra.mxu1 %v1582_v6  ;;  %1723 = vmatpush.msra.mxu0 %v1565_v12  ;;  %v1687_v35 = vld [vmem:[%s3517_s3 + $0x3f8] sm:$0xff]  ;;  %v1576_v37 = vld [vmem:[%s3517_s3 + $0x80] sm:$0xff]  ;;  %v1638_v38 = vld [vmem:[%s3517_s3 + $0x270] sm:$0xff] }
 0x20f   : > { %1783 = vmatpush.msra.mxu3 %v1613_v13  ;;  %1764 = vmatpush.msra.mxu2 %v1596_v14  ;;  %v1655_v50 = vld [vmem:[%s3517_s3 + $0x2f8] sm:$0xff]  ;;  %v1669_v23 = vld [vmem:[%s3517_s3 + $0x368] sm:$0xff]  ;;  %v1686_v39 = vld [vmem:[%s3517_s3 + $0x3f0] sm:$0xff] }
 0x210   : > { %1743 = vmatpush.msra.mxu1 %v1581_v9  ;;  %1724 = vmatpush.msra.mxu0 %v1564_v15  ;;  %v1637_v40 = vld [vmem:[%s3517_s3 + $0x268] sm:$0xff]  ;;  %v1654_v41 = vld [vmem:[%s3517_s3 + $0x2f0] sm:$0xff]  ;;  %v1668_v42 = vld [vmem:[%s3517_s3 + $0x360] sm:$0xff] }
 0x211   : > { %1784 = vmatpush.msra.mxu3 %v1612_v16  ;;  %1765 = vmatpush.msra.mxu2 %v1595_v46  ;;  %v1685_v43 = vld [vmem:[%s3517_s3 + $0x3e8] sm:$0xff]  ;;  %v1636_v44 = vld [vmem:[%s3517_s3 + $0x260] sm:$0xff]  ;;  %v1667_v48 = vld [vmem:[%s3517_s3 + $0x358] sm:$0xff] }
 0x212   : > { %1744 = vmatpush.msra.mxu1 %v1580_v17  ;;  %1725 = vmatpush.msra.mxu0 %v1563_v18  ;;  %v1653_v45 = vld [vmem:[%s3517_s3 + $0x2e8] sm:$0xff]  ;;  %v1684_v49 = vld [vmem:[%s3517_s3 + $0x3e0] sm:$0xff]  ;;  %v1635_v54 = vld [vmem:[%s3517_s3 + $0x258] sm:$0xff] }
 0x213   : > { %1785 = vmatpush.msra.mxu3 %v1611_v19  ;;  %1766 = vmatpush.msra.mxu2 %v1594_v21  ;;  %v1532_v47 = vld [vmem:[#allocation8] sm:$0xff]  ;;  %v1652_v57 = vld [vmem:[%s3517_s3 + $0x2e0] sm:$0xff]  ;;  %v1666_v60 = vld [vmem:[%s3517_s3 + $0x350] sm:$0xff] }
 0x214   : > { %1745 = vmatpush.msra.mxu1 %v1579_v20  ;;  %1726 = vmatpush.msra.mxu0 %v1562_v22  ;;  %v1534_v51 = vperm.slane %v1532_v47, 0  ;;  %v1535_v52 = vperm.slane %v1532_v47, 1  ;;  %v1536_v53 = vperm.slane %v1532_v47, 2  ;;  %v1537_v55 = vperm.slane %v1532_v47, 3  ;;  %v1683_v62 = vld [vmem:[%s3517_s3 + $0x3d8] sm:$0xff]  ;;  %v1634_v1 = vld [vmem:[%s3517_s3 + $0x250] sm:$0xff] }
 0x215   : > { %1786 = vmatpush.msra.mxu3 %v1610_v24  ;;  %1767 = vmatpush.msra.mxu2 %v1593_v25  ;;  %v1538_v58 = vperm.slane %v1532_v47, 4  ;;  %v1539_v59 = vperm.slane %v1532_v47, 5  ;;  %v1540_v61 = vperm.slane %v1532_v47, 6  ;;  %v1651_v2 = vld [vmem:[%s3517_s3 + $0x2d8] sm:$0xff]  ;;  %v1530_v3 = vld [vmem:[#allocation2] sm:$0xff]  ;;  %v1541_v4 = vperm.slane %v1532_v47, 7 }
 0x216   : > { %1746 = vmatpush.msra.mxu1 %v1578_v56  ;;  %1727 = vmatpush.msra.mxu0 %v1561_v26  ;;  %v1542_v29 = vrot.slane %v1535_v52, 6  ;;  %v1543_v63 = vrot.slane %v1536_v53, 4  ;;  %v1544_v0 = vrot.slane %v1537_v55, 2  ;;  %v1665_v8 = vld [vmem:[%s3517_s3 + $0x348] sm:$0xff]  ;;  %v1682_v10 = vld [vmem:[%s3517_s3 + $0x3d0] sm:$0xff]  ;;  %v1664_v16 = vld [vmem:[%s3517_s3 + $0x340] sm:$0xff] }
 0x217   : > { %1787 = vmatpush.msra.mxu3 %v1609_v27  ;;  %1768 = vmatpush.msra.mxu2 %v1592_v30  ;;  %v1545_v5 = vrot.slane %v1539_v59, 6  ;;  %v1546_v7 = vrot.slane %v1540_v61, 4  ;;  %v1633_v12 = vld [vmem:[%s3517_s3 + $0x248] sm:$0xff]  ;;  %v1650_v13 = vld [vmem:[%s3517_s3 + $0x2d0] sm:$0xff]  ;;  %v1547_v14 = vrot.slane %v1541_v4, 2  ;;  %v1632_v19 = vld [vmem:[%s3517_s3 + $0x240] sm:$0xff] }
 0x218   : > { %1747 = vmatpush.msra.mxu1 %v1577_v28  ;;  %1728 = vmatpush.msra.mxu0 %v1560_v31  ;;  %v1548_v6 = vsel %vm1511_vm0, %v1534_v51, %v1542_v29  ;;  %v1549_v11 = vsel %vm1513_vm1, %v1543_v63, %v1544_v0  ;;  %v1681_v17 = vld [vmem:[%s3517_s3 + $0x3c8] sm:$0xff]  ;;  %v1531_v18 = vld [vmem:[#allocation2 + $0x8] sm:$0xff]  ;;  %v1663_v22 = vld [vmem:[%s3517_s3 + $0x338] sm:$0xff] }
 0x219   : > { %1833 = vmatpush.msrb.mxu2 %v1671_v32  ;;  %1788 = vmatpush.msra.mxu3 %v1608_v33  ;;  %v1550_v9 = vsel %vm1515_vm2, %v1548_v6, %v1549_v11  ;;  %v1551_v15 = vsel %vm1511_vm0, %v1538_v58, %v1545_v5  ;;  %v1649_v20 = vld [vmem:[%s3517_s3 + $0x2c8] sm:$0xff]  ;;  %v1552_v21 = vsel %vm1513_vm1, %v1546_v7, %v1547_v14  ;;  %v1680_v24 = vld [vmem:[%s3517_s3 + $0x3c0] sm:$0xff]  ;;  %v1631_v26 = vld [vmem:[%s3517_s3 + $0x238] sm:$0xff] }
 0x21a   : > { %1793 = vmatpush.msrb.mxu0 %v1639_v34  ;;  %1748 = vmatpush.msra.mxu1 %v1576_v37  ;;  %v1556_v46 = vadd.f32 %v1550_v9, %v1530_v3  ;;  %v1553_v25 = vsel %vm1515_vm2, %v1551_v15, %v1552_v21  ;;  %v1648_v27 = vld [vmem:[%s3517_s3 + $0x2c0] sm:$0xff]  ;;  %v1662_v30 = vld [vmem:[%s3517_s3 + $0x330] sm:$0xff]  ;;  %v1679_v31 = vld [vmem:[%s3517_s3 + $0x3b8] sm:$0xff] }
 0x21b   : > { %1853 = vmatpush.msrb.mxu3 %v1687_v35  ;;  %1834 = vmatpush.msrb.mxu2 %v1670_v36  ;;  %v1557_v28 = vadd.f32 %v1553_v25, %v1531_v18  ;;  %v1630_v32 = vld [vmem:[%s3517_s3 + $0x230] sm:$0xff]  ;;  %v1647_v33 = vld [vmem:[%s3517_s3 + $0x2b8] sm:$0xff]  ;;  %v1661_v35 = vld [vmem:[%s3517_s3 + $0x328] sm:$0xff] }
 0x21c   : > { %1794 = vmatpush.msrb.mxu0 %v1638_v38  ;;  %1813 = vmatpush.msrb.mxu1 %v1655_v50  ;;  %v1558_v56 = vmax.f32 %v1556_v46, 0.0  ;;  %v1678_v36 = vld [vmem:[%s3517_s3 + $0x3b0] sm:$0xff]  ;;  %v1629_v37 = vld [vmem:[%s3517_s3 + $0x228] sm:$0xff]  ;;  %v1660_v50 = vld [vmem:[%s3517_s3 + $0x320] sm:$0xff] }
 0x21d   : > { %1835 = vmatpush.msrb.mxu2 %v1669_v23  ;;  %1854 = vmatpush.msrb.mxu3 %v1686_v39  ;;  %v1559_v34 = vmax.f32 %v1557_v28, 0.0  ;;  %v1646_v38 = vld [vmem:[%s3517_s3 + $0x2b0] sm:$0xff]  ;;  %v1677_v23 = vld [vmem:[%s3517_s3 + $0x3a8] sm:$0xff]  ;;  %v1628_v39 = vld [vmem:[%s3517_s3 + $0x220] sm:$0xff] }
 0x21e   : > { %1795 = vmatpush.msrb.mxu0 %v1637_v40  ;;  %1814 = vmatpush.msrb.mxu1 %v1654_v41  ;;  %1694 = vst [vmem:[#allocation1] ss:$4 sm:$0xff] %v1558_v56  ;;  %v1645_v40 = vld [vmem:[%s3517_s3 + $0x2a8] sm:$0xff]  ;;  %v1659_v41 = vld [vmem:[%s3517_s3 + $0x318] sm:$0xff]  ;;  %v1626_v53 = vld [vmem:[%s3517_s3 + $0x210] sm:$0xff] }
 0x21f   : > { %1836 = vmatpush.msrb.mxu2 %v1668_v42  ;;  %1855 = vmatpush.msrb.mxu3 %v1685_v43  ;;  %1696 = vst [vmem:[#allocation1 + $0x20] ss:$4 sm:$0xff] %v1559_v34  ;;  %v1676_v42 = vld [vmem:[%s3517_s3 + $0x3a0] sm:$0xff]  ;;  %v1627_v47 = vld [vmem:[%s3517_s3 + $0x218] sm:$0xff]  ;;  %v1625_v58 = vld [vmem:[%s3517_s3 + $0x208] sm:$0xff] }
 0x220   : > { %1796 = vmatpush.msrb.mxu0 %v1636_v44  ;;  %1815 = vmatpush.msrb.mxu1 %v1653_v45  ;;  %v1675_v51 = vld [vmem:[%s3517_s3 + $0x398] sm:$0xff]  ;;  %v1642_v59 = vld [vmem:[%s3517_s3 + $0x290] sm:$0xff]  ;;  %v1656_v61 = vld [vmem:[%s3517_s3 + $0x300] sm:$0xff] }
 0x221   : > { %1837 = vmatpush.msrb.mxu2 %v1667_v48  ;;  %1856 = vmatpush.msrb.mxu3 %v1684_v49  ;;  %v1644_v48 = vld [vmem:[%s3517_s3 + $0x2a0] sm:$0xff]  ;;  %v1658_v49 = vld [vmem:[%s3517_s3 + $0x310] sm:$0xff]  ;;  %v1643_v55 = vld [vmem:[%s3517_s3 + $0x298] sm:$0xff] }
 0x222   : > { %1797 = vmatpush.msrb.mxu0 %v1635_v54  ;;  %1816 = vmatpush.msrb.mxu1 %v1652_v57  ;;  %v1657_v54 = vld [vmem:[%s3517_s3 + $0x308] sm:$0xff]  ;;  %v1674_v57 = vld [vmem:[%s3517_s3 + $0x390] sm:$0xff]  ;;  %v1624_v29 = vld [vmem:[%s3517_s3 + $0x200] sm:$0xff] }
 0x223   : > { %1838 = vmatpush.msrb.mxu2 %v1666_v60  ;;  %1857 = vmatpush.msrb.mxu3 %v1683_v62  ;;  %v1673_v60 = vld [vmem:[%s3517_s3 + $0x388] sm:$0xff]  ;;  %v1672_v0 = vld [vmem:[%s3517_s3 + $0x380] sm:$0xff]  ;;  %v2137_v5 = vld [vmem:[#allocation9] ss:$0 sm:$0xff] }
 0x224   : > { %1798 = vmatpush.msrb.mxu0 %v1634_v1  ;;  %1817 = vmatpush.msrb.mxu1 %v1651_v2  ;;  %v1641_v63 = vld [vmem:[%s3517_s3 + $0x288] sm:$0xff]  ;;  %v1640_v3 = vld [vmem:[%s3517_s3 + $0x280] sm:$0xff] }
 0x225   : > { %1839 = vmatpush.msrb.mxu2 %v1665_v8  ;;  %1858 = vmatpush.msrb.mxu3 %v1682_v10  ;;  %v1699_v43 = vld.sshfl [vmem:[#allocation1 + $0x10] sm:$0xff pattern:$0x73625140]  ;;  %v1697_v44 = vld.sshfl [vmem:[#allocation1] sm:$0xff pattern:$0x73625140] }
 0x226   : > { %1799 = vmatpush.msrb.mxu0 %v1633_v12  ;;  %1818 = vmatpush.msrb.mxu1 %v1650_v13  ;;  %v1700_v45 = vld.sshfl [vmem:[#allocation1 + $0x18] sm:$0xff pattern:$0x73625140]  ;;  %v1698_v52 = vld.sshfl [vmem:[#allocation1 + $0x8] sm:$0xff pattern:$0x73625140] }
 0x227   : > { %1840 = vmatpush.msrb.mxu2 %v1664_v16  ;;  %1859 = vmatpush.msrb.mxu3 %v1681_v17  ;;  %v1703_v62 = vld.sshfl [vmem:[#allocation1 + $0x30] sm:$0xff pattern:$0x73625140]  ;;  %v1701_v1 = vld.sshfl [vmem:[#allocation1 + $0x20] sm:$0xff pattern:$0x73625140] }
 0x228   : > { %1800 = vmatpush.msrb.mxu0 %v1632_v19  ;;  %1819 = vmatpush.msrb.mxu1 %v1649_v20  ;;  %v1704_v2 = vld.sshfl [vmem:[#allocation1 + $0x38] sm:$0xff pattern:$0x73625140]  ;;  %v1702_v4 = vld.sshfl [vmem:[#allocation1 + $0x28] sm:$0xff pattern:$0x73625140] }
 0x229   : > { %1841 = vmatpush.msrb.mxu2 %v1663_v22  ;;  %1860 = vmatpush.msrb.mxu3 %v1680_v24 }
 0x22a   : > { %1801 = vmatpush.msrb.mxu0 %v1631_v26  ;;  %1820 = vmatpush.msrb.mxu1 %v1648_v27 }
 0x22b   : > { %1842 = vmatpush.msrb.mxu2 %v1662_v30  ;;  %1861 = vmatpush.msrb.mxu3 %v1679_v31 }
 0x22c   : > { %1802 = vmatpush.msrb.mxu0 %v1630_v32  ;;  %1821 = vmatpush.msrb.mxu1 %v1647_v33 }
 0x22d   : > { %1843 = vmatpush.msrb.mxu2 %v1661_v35  ;;  %1862 = vmatpush.msrb.mxu3 %v1678_v36 }
 0x22e   : > { %1803 = vmatpush.msrb.mxu0 %v1629_v37  ;;  %1822 = vmatpush.msrb.mxu1 %v1646_v38 }
 0x22f   : > { %1844 = vmatpush.msrb.mxu2 %v1660_v50  ;;  %1863 = vmatpush.msrb.mxu3 %v1677_v23 }
 0x230   : > { %1769 = vmatmul.f32.vlgmr.msra.gmra.mxu2 %v1699_v43  ;;  %1804 = vmatpush.msrb.mxu0 %v1628_v39 }
 0x231   : > { %1823 = vmatpush.msrb.mxu1 %v1645_v40  ;;  %1845 = vmatpush.msrb.mxu2 %v1659_v41 }
 0x232   : > { %1864 = vmatpush.msrb.mxu3 %v1676_v42  ;;  %1729 = vmatmul.f32.vlgmr.msra.gmra.mxu0 %v1697_v44 }
 0x233   : > { %1789 = vmatmul.f32.vlgmr.msra.gmra.mxu3 %v1700_v45  ;;  %1805 = vmatpush.msrb.mxu0 %v1627_v47 }
 0x234   : > { %1824 = vmatpush.msrb.mxu1 %v1644_v48  ;;  %1846 = vmatpush.msrb.mxu2 %v1658_v49 }
 0x235   : > { %1865 = vmatpush.msrb.mxu3 %v1675_v51  ;;  %1749 = vmatmul.f32.vlgmr.msra.gmra.mxu1 %v1698_v52 }
 0x236   : > { %1806 = vmatpush.msrb.mxu0 %v1626_v53  ;;  %1825 = vmatpush.msrb.mxu1 %v1643_v55 }
 0x237   : > { %1847 = vmatpush.msrb.mxu2 %v1657_v54  ;;  %1866 = vmatpush.msrb.mxu3 %v1674_v57 }
 0x238   : > { %1807 = vmatpush.msrb.mxu0 %v1625_v58  ;;  %1826 = vmatpush.msrb.mxu1 %v1642_v59 }
 0x239   : > { %1848 = vmatpush.msrb.mxu2 %v1656_v61  ;;  %1867 = vmatpush.msrb.mxu3 %v1673_v60 }
 0x23a   : > { %1849 = vmatmul.f32.vlgmr.msrb.gmra.mxu2 %v1703_v62  ;;  %1808 = vmatpush.msrb.mxu0 %v1624_v29 }
 0x23b   : > { %1827 = vmatpush.msrb.mxu1 %v1641_v63  ;;  %1868 = vmatpush.msrb.mxu3 %v1672_v0 }
 0x23c   : > { %1809 = vmatmul.f32.vlgmr.msrb.gmra.mxu0 %v1701_v1  ;;  %1869 = vmatmul.f32.vlgmr.msrb.gmra.mxu3 %v1704_v2 }
 0x23d   : > { %1828 = vmatpush.msrb.mxu1 %v1640_v3 }
 0x23e   : > { %1829 = vmatmul.f32.vlgmr.msrb.gmra.mxu1 %v1702_v4 }
 0x2af   : > { %v1730_v7 = vpop.f32.mrf.mxu0 }
 0x2b0   : > { %v1731_v8 = vadd.f32 %v2137_v5, %v1730_v7 }
 0x2b2   : > { %v1750_v10 = vpop.f32.mrf.mxu1 }
 0x2b3   : > { %v1751_v6 = vadd.f32 %v1750_v10, %v1731_v8  ;;  %v1770_v11 = vpop.f32.mrf.mxu2 }
 0x2b5   : > { %v1771_v12 = vadd.f32 %v1770_v11, %v1751_v6 }
 0x2b6   : > { %v1790_v13 = vpop.f32.mrf.mxu3 }
 0x2b7   : > { %v1791_v9 = vadd.f32 %v1790_v13, %v1771_v12 }
 0x2b9   : > { %v1810_v14 = vpop.f32.mrf.mxu0 }
 0x2ba   : > { %v1811_v15 = vadd.f32 %v1810_v14, %v1791_v9 }
 0x2bb   : > { %v1830_v16 = vpop.f32.mrf.mxu1 }
 0x2bc   : > { %v1831_v17 = vadd.f32 %v1830_v16, %v1811_v15 }
 0x2bd   : > { %v1850_v46 = vpop.f32.mrf.mxu2 }
 0x2be   : > { %v1851_v18 = vadd.f32 %v1850_v46, %v1831_v17 }
 0x2bf   : > { %v1870_v19 = vpop.f32.mrf.mxu3 }
 0x2c0   : > { %v1871_v20 = vadd.f32 %v1870_v19, %v1851_v18 }
 0x2c2   : > { %v1874_v21 = vsel %vm1873_vm3, %v1871_v20, -inf }
 0x2c3   : > { %1875 = vmax.xlane.f32.xlu0 %v1874_v21 }
 0x336   : > { %v1876_v22 = vpop.xlane.xlu0 %1875 }
 0x337   : > { %v1877_v24 = vsub.f32 %v1871_v20, %v1876_v22 }
 0x339   : > { %v1878_v56 = vmul.f32 1.442695, %v1877_v24 }
 0x33b   : > { %2138 = vpow2.f32 %v1878_v56 }
 0x341   : > { %v2139_v25 = vpop.eup %2138 }
 0x342   : > { %v1880_v26 = vsel %vm1873_vm3, %v2139_v25, 0.0 }
 0x343   : > { %1881 = vadd.xlane.f32.xlu0 %v1880_v26 }
 0x3b6   : > { %v1882_v27 = vpop.xlane.xlu0 %1881 }
 0x3b7   : > { %2140 = vrcp.f32 %v1882_v27  ;;  %v1894_v32 = vand.u32 2147483648, %v1882_v27  ;;  %v1892_v34 = vand.u32 2147483647, %v1882_v27  ;;  %vm1888_vm5 = vweird.f32 %v1882_v27 }
 0x3b9   : > { %v1895_v36 = vor.u32 1.1754944e-38, %v1894_v32  ;;  %vm1893_vm7 = vcmp.eq.f32.partialorder %v1892_v34, 8.507059e+37 }
 0x3bd   : > { %v2141_v28 = vpop.eup %2140 }
 0x3be   : > { %v1884_v30 = vmul.f32 %v2141_v28, %v1882_v27  ;;  %vm1889_vm4 = vweird.f32 %v2141_v28 }
 0x3bf   : > { %vm1890_vm6 = vmor %vm1888_vm5, %vm1889_vm4 }
 0x3c0   : > { %v1885_v31 = vsub.f32 1.0, %v1884_v30 }
 0x3c2   : > { %v1886_v33 = vmul.f32 %v2141_v28, %v1885_v31 }
 0x3c4   : > { %v1887_v35 = vadd.f32 %v2141_v28, %v1886_v33 }
 0x3c6   : > { %v1891_v37 = vsel %vm1890_vm6, %v2141_v28, %v1887_v35 }
 0x3c7   : > { %v1896_v38 = vsel %vm1893_vm7, %v1895_v36, %v1891_v37 }
 0x3c8   : > { %v1897_v50 = vmul.f32 %v2139_v25, %v1896_v38 }
 0x3ca   : > { %1898 = vst.msk [vmem:[#allocation11] sm:$0x3] %vm1873_vm3, %v1897_v50 }
 0x3cb PF: > { %p2077_p3 = scmp.eq.s32.totalorder %s2423_s24, 3  ;;  %s1909_s0 = sshll.u32 %s3519_s5, 4  ;;  %s1910_s0 = int_to_ptr.hbm [resolvable:$true] %s1909_s0 }
 0x3cc   : > { %s2363_s2 = smov [#allocation11]  }
 0x3cd   : > { %s1907_s25 = sshll.u32 %s2363_s2, 4  ;;  %s1908_s25 = int_to_ptr.vmem [resolvable:$true] %s1907_s25 }
 0x3ce   : > { %2055 = dma.vmem_to_hbm [thread:$0]  (%p2077_p3), %s1908_s25, 32, %s1910_s0, [#allocation5]  }
 0x3cf   : > { %2331 = dma.done.wait (%p2077_p3), [#allocation5], 32  }
 0x3d0   : > { %2333 = vsyncadd (%p2077_p3), [#allocation5], 4294967264 }
 0x3d1 PF: > { %s23_s23 = sadd.s32 1, %s2356_s23   ;;  %s3528_s18 = smov %s2340_s19 }
 0x3d2   : > { %p20_p4 = scmp.ge.s32.totalorder %s23_s23, 6   ;;  %s3529_s19 = smov %s2344_s20 }
 0x3d3   : > { %s3530_s20 = smov %s2466_s26  ;;  %s3531_s21 = smov %s2352_s22 }
 0x3d4   : > { %s3532_s22 = smov %s3534_s12  ;;  %22 = sbr.rel (!%p20_p4) target bundleno = 11 (0xb), region = 108 }
 0x3d9   :  { %1923 = vsyncpa [#allocation4], 1 }
 0x3da   :  { %1925 = vsyncpa [#allocation4 + $0x1], 1 }
 0x3db   :  { %1926 = vsyncpa [#allocation7], 1 }
 0x3dc   :  { %1928 = vsyncpa [#allocation7 + $0x1], 1 }
 0x3dd   :  { %1929 = vsyncpa [#allocation10], 1 }
 0x3de   :  { %1930 = vsyncpa [#allocation5], 1 }
 0x3df   :  { %1932 = vsyncpa [#allocation5 + $0x1], 1 }

</bundles_post_ra>
